<compile_context>
chip_gen: v6e
topology: v6e:2x2x1
jax: 0.10.0
libtpu: 0.0.40
codegen_flags: <defaults>
</compile_context>

<pallas_src>
import functools

import jax
import jax.numpy as jnp
from jax.experimental import pallas as pl
from jax.experimental.pallas import tpu as pltpu


def _rnn_kernel(x_ref, wih_ref, whh_ref, b_ref, h0_ref, out_ref, hN_ref):
    """Fused Elman-RNN forward.

    x_ref  : (S*B, T)  time-major flattened input (row = t*B + b)
    wih_ref: (T, H)    W_ih^T
    whh_ref: (H, H)    W_hh^T
    b_ref  : (1, H)    b_ih + b_hh
    h0_ref : (B, H)    initial hidden
    out_ref: (B, S*H)  per-step hidden states, batch-first, lane-dense
    hN_ref : (B, H)    final hidden
    """
    B, H = h0_ref.shape
    SB, _ = x_ref.shape
    S = SB // B

    # --- hoisted input projection: one MXU matmul, bias folded in -----------
    xp = (
        jnp.dot(x_ref[...], wih_ref[...], preferred_element_type=jnp.float32)
        + b_ref[...]
    )  # (S*B, H)

    whh = whh_ref[...]
    h = h0_ref[...].astype(jnp.float32)

    # --- recurrence: fully unrolled, only h @ W_hh^T on the serial chain ----
    for t in range(S):  # S is a small static trip count -> full unroll
        pre = xp[t * B:(t + 1) * B, :] + jnp.dot(
            h, whh, preferred_element_type=jnp.float32
        )
        h = jnp.tanh(pre)
        # static lane-offset store into the batch-first output slab
        out_ref[:, t * H:(t + 1) * H] = h.astype(out_ref.dtype)

    hN_ref[...] = h.astype(hN_ref.dtype)


@functools.partial(jax.jit, static_argnames=("batch_size", "hidden_size", "time_window"))
def rnn_forward(x, hidden, w_ih, w_hh, b_ih, b_hh, *, batch_size, hidden_size, time_window):
    """Mirror of RNN.forward(x, hidden): returns (out.view(-1, 2), hidden)."""
    B, S, T, H = batch_size, hidden_size, time_window, hidden_size

    x = jnp.reshape(x, (B, S, T)).astype(jnp.float32)
    # tiny input-side transpose so each timestep is a contiguous row block
    x_tm = jnp.reshape(jnp.transpose(x, (1, 0, 2)), (S * B, T))   # (S*B, T)
    h0 = jnp.reshape(hidden, (B, H)).astype(jnp.float32)

    wih_t = jnp.transpose(w_ih)                 # (T, H)
    whh_t = jnp.transpose(w_hh)                 # (H, H)
    bias = jnp.reshape(b_ih + b_hh, (1, H))     # (1, H)

    full = lambda shp: pl.BlockSpec(shp, lambda i: tuple(0 for _ in shp))

    out_flat, h_n = pl.pallas_call(
        _rnn_kernel,
        grid=(1,),
        in_specs=[
            full((S * B, T)),
            full((T, H)),
            full((H, H)),
            full((1, H)),
            full((B, H)),
        ],
        out_specs=[
            full((B, S * H)),
            full((B, H)),
        ],
        out_shape=[
            jax.ShapeDtypeStruct((B, S * H), jnp.float32),
            jax.ShapeDtypeStruct((B, H), jnp.float32),
        ],
        compiler_params=pltpu.CompilerParams(
            dimension_semantics=("arbitrary",)
        ),
    )(x_tm, wih_t, whh_t, bias, h0)

    # (B, S*H) row-major == (B, S, H) row-major -> view(-1, 2) is a free reshape
    out = jnp.reshape(out_flat, (-1, 2))
    hidden_out = jnp.reshape(h_n, (1, B, H))    # (1, B, H)
    return out, hidden_out


def _reference_rnn(x, hidden, w_ih, w_hh, b_ih, b_hh, batch_size, hidden_size, time_window):
    """Pure-JAX reference for correctness checking."""
    B, S, T, H = batch_size, hidden_size, time_window, hidden_size
    x = jnp.reshape(x, (B, S, T)).astype(jnp.float32)
    h = jnp.reshape(hidden, (B, H)).astype(jnp.float32)
    outs = []
    for t in range(S):
        h = jnp.tanh(x[:, t, :] @ w_ih.T + b_ih + h @ w_hh.T + b_hh)
        outs.append(h)
    out = jnp.stack(outs, axis=1)               # (B, S, H)
    return jnp.reshape(out, (-1, 2)), jnp.reshape(h, (1, B, H))


def init_hidden(batch_size, hidden_size):
    return jnp.zeros((1, batch_size, hidden_size), dtype=jnp.float32)


if __name__ == "__main__":
    # Small shapes consistent with the module.
    batch_size = 2
    hidden_size = 32     # also the sequence length after the .view()
    time_window = 8      # RNN input_size

    key = jax.random.PRNGKey(0)
    k_x, k_wih, k_whh, k_bih, k_bhh = jax.random.split(key, 5)

    # Deterministic parameter init, matching nn.RNN's U(-1/sqrt(H), 1/sqrt(H)).
    bound = 1.0 / (hidden_size ** 0.5)
    w_ih = jax.random.uniform(k_wih, (hidden_size, time_window), jnp.float32, -bound, bound)
    w_hh = jax.random.uniform(k_whh, (hidden_size, hidden_size), jnp.float32, -bound, bound)
    b_ih = jax.random.uniform(k_bih, (hidden_size,), jnp.float32, -bound, bound)
    b_hh = jax.random.uniform(k_bhh, (hidden_size,), jnp.float32, -bound, bound)

    # Input: anything that views to (B, S, T); build it directly at that shape.
    x = jax.random.normal(k_x, (batch_size, hidden_size, time_window), jnp.float32)
    hidden = init_hidden(batch_size, hidden_size)

    out, h_n = rnn_forward(
        x, hidden, w_ih, w_hh, b_ih, b_hh,
        batch_size=batch_size, hidden_size=hidden_size, time_window=time_window,
    )
    out = jax.block_until_ready(out)
    h_n = jax.block_until_ready(h_n)

    # Sanity-check against a pure-JAX reference.
    ref_out, ref_h = _reference_rnn(
        x, hidden, w_ih, w_hh, b_ih, b_hh, batch_size, hidden_size, time_window
    )
    assert out.shape == (batch_size * hidden_size * hidden_size // 2, 2)
    assert h_n.shape == (1, batch_size, hidden_size)
    assert jnp.allclose(out, ref_out, atol=1e-5, rtol=1e-5)
    assert jnp.allclose(h_n, ref_h, atol=1e-5, rtol=1e-5)

    print("KERNEL_OK")
</pallas_src>

<mosaic_0001>
module attributes {stable_mosaic.version = 11 : i64} {
  func.func @_rnn_kernel(%arg0: i32, %arg1: memref<64x8xf32, #tpu.memory_space<vmem>>, %arg2: memref<8x32xf32, #tpu.memory_space<vmem>>, %arg3: memref<32x32xf32, #tpu.memory_space<vmem>>, %arg4: memref<1x32xf32, #tpu.memory_space<vmem>>, %arg5: memref<2x32xf32, #tpu.memory_space<vmem>>, %arg6: memref<2x1024xf32, #tpu.memory_space<vmem>>, %arg7: memref<2x32xf32, #tpu.memory_space<vmem>>) attributes {dimension_semantics = [#tpu.dimension_semantics<arbitrary>], iteration_bounds = array<i64: 1>, scalar_prefetch = 0 : i64, scratch_operands = 0 : i64, tpu.core_type = #tpu.core_type<tc>, window_params = [{pipeline_mode = #tpu.pipeline_mode<synchronous>, transform_indices = @transform_0, window_bounds = array<i64: 64, 8>}, {pipeline_mode = #tpu.pipeline_mode<synchronous>, transform_indices = @transform_1, window_bounds = array<i64: 8, 32>}, {pipeline_mode = #tpu.pipeline_mode<synchronous>, transform_indices = @transform_2, window_bounds = array<i64: 32, 32>}, {pipeline_mode = #tpu.pipeline_mode<synchronous>, transform_indices = @transform_3, window_bounds = array<i64: 1, 32>}, {pipeline_mode = #tpu.pipeline_mode<synchronous>, transform_indices = @transform_4, window_bounds = array<i64: 2, 32>}, {pipeline_mode = #tpu.pipeline_mode<synchronous>, transform_indices = @transform_5, window_bounds = array<i64: 2, 1024>}, {pipeline_mode = #tpu.pipeline_mode<synchronous>, transform_indices = @transform_6, window_bounds = array<i64: 2, 32>}]} {
    %c0 = arith.constant 0 : index
    %c0_0 = arith.constant 0 : index
    %0 = vector.load %arg1[%c0, %c0_0] : memref<64x8xf32, #tpu.memory_space<vmem>>, vector<64x8xf32>
    %c0_1 = arith.constant 0 : index
    %c0_2 = arith.constant 0 : index
    %1 = vector.load %arg2[%c0_1, %c0_2] : memref<8x32xf32, #tpu.memory_space<vmem>>, vector<8x32xf32>
    %cst = arith.constant dense<0.000000e+00> : vector<64x32xf32>
    %2 = tpu.matmul %0, %1, %cst {dimension_numbers = #tpu.dot_dimension_numbers<[1], [0], [0], [1], [0, 0, 1, 1], [], []>} : vector<64x8xf32>, vector<8x32xf32>, vector<64x32xf32> -> vector<64x32xf32>
    %c0_3 = arith.constant 0 : index
    %c0_4 = arith.constant 0 : index
    %3 = vector.load %arg4[%c0_3, %c0_4] : memref<1x32xf32, #tpu.memory_space<vmem>>, vector<1x32xf32>
    %4 = vector.broadcast %3 : vector<1x32xf32> to vector<64x32xf32>
    %5 = arith.addf %2, %4 : vector<64x32xf32>
    %c0_5 = arith.constant 0 : index
    %c0_6 = arith.constant 0 : index
    %6 = vector.load %arg3[%c0_5, %c0_6] : memref<32x32xf32, #tpu.memory_space<vmem>>, vector<32x32xf32>
    %c0_7 = arith.constant 0 : index
    %c0_8 = arith.constant 0 : index
    %7 = vector.load %arg5[%c0_7, %c0_8] : memref<2x32xf32, #tpu.memory_space<vmem>>, vector<2x32xf32>
    %8 = vector.extract_strided_slice %5 {offsets = [0, 0], sizes = [2, 32], strides = [1, 1]} : vector<64x32xf32> to vector<2x32xf32>
    %cst_9 = arith.constant dense<0.000000e+00> : vector<2x32xf32>
    %9 = tpu.matmul %7, %6, %cst_9 {dimension_numbers = #tpu.dot_dimension_numbers<[1], [0], [0], [1], [0, 0, 1, 1], [], []>} : vector<2x32xf32>, vector<32x32xf32>, vector<2x32xf32> -> vector<2x32xf32>
    %10 = arith.addf %8, %9 : vector<2x32xf32>
    %11 = math.tanh %10 : vector<2x32xf32>
    %c0_10 = arith.constant 0 : index
    %c0_11 = arith.constant 0 : index
    %12 = vector.load %arg6[%c0_10, %c0_11] : memref<2x1024xf32, #tpu.memory_space<vmem>>, vector<2x32xf32>
    tpu.vector_store %arg6[%c0_10, %c0_11], %11 {strides = array<i32>} : memref<2x1024xf32, #tpu.memory_space<vmem>>, vector<2x32xf32>,
    %13 = vector.extract_strided_slice %5 {offsets = [2, 0], sizes = [2, 32], strides = [1, 1]} : vector<64x32xf32> to vector<2x32xf32>
    %cst_12 = arith.constant dense<0.000000e+00> : vector<2x32xf32>
    %14 = tpu.matmul %11, %6, %cst_12 {dimension_numbers = #tpu.dot_dimension_numbers<[1], [0], [0], [1], [0, 0, 1, 1], [], []>} : vector<2x32xf32>, vector<32x32xf32>, vector<2x32xf32> -> vector<2x32xf32>
    %15 = arith.addf %13, %14 : vector<2x32xf32>
    %16 = math.tanh %15 : vector<2x32xf32>
    %c0_13 = arith.constant 0 : index
    %c32 = arith.constant 32 : index
    %17 = vector.load %arg6[%c0_13, %c32] : memref<2x1024xf32, #tpu.memory_space<vmem>>, vector<2x32xf32>
    tpu.vector_store %arg6[%c0_13, %c32], %16 {strides = array<i32>} : memref<2x1024xf32, #tpu.memory_space<vmem>>, vector<2x32xf32>,
    %18 = vector.extract_strided_slice %5 {offsets = [4, 0], sizes = [2, 32], strides = [1, 1]} : vector<64x32xf32> to vector<2x32xf32>
    %cst_14 = arith.constant dense<0.000000e+00> : vector<2x32xf32>
    %19 = tpu.matmul %16, %6, %cst_14 {dimension_numbers = #tpu.dot_dimension_numbers<[1], [0], [0], [1], [0, 0, 1, 1], [], []>} : vector<2x32xf32>, vector<32x32xf32>, vector<2x32xf32> -> vector<2x32xf32>
    %20 = arith.addf %18, %19 : vector<2x32xf32>
    %21 = math.tanh %20 : vector<2x32xf32>
    %c0_15 = arith.constant 0 : index
    %c64 = arith.constant 64 : index
    %22 = vector.load %arg6[%c0_15, %c64] : memref<2x1024xf32, #tpu.memory_space<vmem>>, vector<2x32xf32>
    tpu.vector_store %arg6[%c0_15, %c64], %21 {strides = array<i32>} : memref<2x1024xf32, #tpu.memory_space<vmem>>, vector<2x32xf32>,
    %23 = vector.extract_strided_slice %5 {offsets = [6, 0], sizes = [2, 32], strides = [1, 1]} : vector<64x32xf32> to vector<2x32xf32>
    %cst_16 = arith.constant dense<0.000000e+00> : vector<2x32xf32>
    %24 = tpu.matmul %21, %6, %cst_16 {dimension_numbers = #tpu.dot_dimension_numbers<[1], [0], [0], [1], [0, 0, 1, 1], [], []>} : vector<2x32xf32>, vector<32x32xf32>, vector<2x32xf32> -> vector<2x32xf32>
    %25 = arith.addf %23, %24 : vector<2x32xf32>
    %26 = math.tanh %25 : vector<2x32xf32>
    %c0_17 = arith.constant 0 : index
    %c96 = arith.constant 96 : index
    %27 = vector.load %arg6[%c0_17, %c96] : memref<2x1024xf32, #tpu.memory_space<vmem>>, vector<2x32xf32>
    tpu.vector_store %arg6[%c0_17, %c96], %26 {strides = array<i32>} : memref<2x1024xf32, #tpu.memory_space<vmem>>, vector<2x32xf32>,
    %28 = vector.extract_strided_slice %5 {offsets = [8, 0], sizes = [2, 32], strides = [1, 1]} : vector<64x32xf32> to vector<2x32xf32>
    %cst_18 = arith.constant dense<0.000000e+00> : vector<2x32xf32>
    %29 = tpu.matmul %26, %6, %cst_18 {dimension_numbers = #tpu.dot_dimension_numbers<[1], [0], [0], [1], [0, 0, 1, 1], [], []>} : vector<2x32xf32>, vector<32x32xf32>, vector<2x32xf32> -> vector<2x32xf32>
    %30 = arith.addf %28, %29 : vector<2x32xf32>
    %31 = math.tanh %30 : vector<2x32xf32>
    %c0_19 = arith.constant 0 : index
    %c128 = arith.constant 128 : index
    %32 = vector.load %arg6[%c0_19, %c128] : memref<2x1024xf32, #tpu.memory_space<vmem>>, vector<2x32xf32>
    tpu.vector_store %arg6[%c0_19, %c128], %31 {strides = array<i32>} : memref<2x1024xf32, #tpu.memory_space<vmem>>, vector<2x32xf32>,
    %33 = vector.extract_strided_slice %5 {offsets = [10, 0], sizes = [2, 32], strides = [1, 1]} : vector<64x32xf32> to vector<2x32xf32>
    %cst_20 = arith.constant dense<0.000000e+00> : vector<2x32xf32>
    %34 = tpu.matmul %31, %6, %cst_20 {dimension_numbers = #tpu.dot_dimension_numbers<[1], [0], [0], [1], [0, 0, 1, 1], [], []>} : vector<2x32xf32>, vector<32x32xf32>, vector<2x32xf32> -> vector<2x32xf32>
    %35 = arith.addf %33, %34 : vector<2x32xf32>
    %36 = math.tanh %35 : vector<2x32xf32>
    %c0_21 = arith.constant 0 : index
    %c160 = arith.constant 160 : index
    %37 = vector.load %arg6[%c0_21, %c160] : memref<2x1024xf32, #tpu.memory_space<vmem>>, vector<2x32xf32>
    tpu.vector_store %arg6[%c0_21, %c160], %36 {strides = array<i32>} : memref<2x1024xf32, #tpu.memory_space<vmem>>, vector<2x32xf32>,
    %38 = vector.extract_strided_slice %5 {offsets = [12, 0], sizes = [2, 32], strides = [1, 1]} : vector<64x32xf32> to vector<2x32xf32>
    %cst_22 = arith.constant dense<0.000000e+00> : vector<2x32xf32>
    %39 = tpu.matmul %36, %6, %cst_22 {dimension_numbers = #tpu.dot_dimension_numbers<[1], [0], [0], [1], [0, 0, 1, 1], [], []>} : vector<2x32xf32>, vector<32x32xf32>, vector<2x32xf32> -> vector<2x32xf32>
    %40 = arith.addf %38, %39 : vector<2x32xf32>
    %41 = math.tanh %40 : vector<2x32xf32>
    %c0_23 = arith.constant 0 : index
    %c192 = arith.constant 192 : index
    %42 = vector.load %arg6[%c0_23, %c192] : memref<2x1024xf32, #tpu.memory_space<vmem>>, vector<2x32xf32>
    tpu.vector_store %arg6[%c0_23, %c192], %41 {strides = array<i32>} : memref<2x1024xf32, #tpu.memory_space<vmem>>, vector<2x32xf32>,
    %43 = vector.extract_strided_slice %5 {offsets = [14, 0], sizes = [2, 32], strides = [1, 1]} : vector<64x32xf32> to vector<2x32xf32>
    %cst_24 = arith.constant dense<0.000000e+00> : vector<2x32xf32>
    %44 = tpu.matmul %41, %6, %cst_24 {dimension_numbers = #tpu.dot_dimension_numbers<[1], [0], [0], [1], [0, 0, 1, 1], [], []>} : vector<2x32xf32>, vector<32x32xf32>, vector<2x32xf32> -> vector<2x32xf32>
    %45 = arith.addf %43, %44 : vector<2x32xf32>
    %46 = math.tanh %45 : vector<2x32xf32>
    %c0_25 = arith.constant 0 : index
    %c224 = arith.constant 224 : index
    %47 = vector.load %arg6[%c0_25, %c224] : memref<2x1024xf32, #tpu.memory_space<vmem>>, vector<2x32xf32>
    tpu.vector_store %arg6[%c0_25, %c224], %46 {strides = array<i32>} : memref<2x1024xf32, #tpu.memory_space<vmem>>, vector<2x32xf32>,
    %48 = vector.extract_strided_slice %5 {offsets = [16, 0], sizes = [2, 32], strides = [1, 1]} : vector<64x32xf32> to vector<2x32xf32>
    %cst_26 = arith.constant dense<0.000000e+00> : vector<2x32xf32>
    %49 = tpu.matmul %46, %6, %cst_26 {dimension_numbers = #tpu.dot_dimension_numbers<[1], [0], [0], [1], [0, 0, 1, 1], [], []>} : vector<2x32xf32>, vector<32x32xf32>, vector<2x32xf32> -> vector<2x32xf32>
    %50 = arith.addf %48, %49 : vector<2x32xf32>
    %51 = math.tanh %50 : vector<2x32xf32>
    %c0_27 = arith.constant 0 : index
    %c256 = arith.constant 256 : index
    %52 = vector.load %arg6[%c0_27, %c256] : memref<2x1024xf32, #tpu.memory_space<vmem>>, vector<2x32xf32>
    tpu.vector_store %arg6[%c0_27, %c256], %51 {strides = array<i32>} : memref<2x1024xf32, #tpu.memory_space<vmem>>, vector<2x32xf32>,
    %53 = vector.extract_strided_slice %5 {offsets = [18, 0], sizes = [2, 32], strides = [1, 1]} : vector<64x32xf32> to vector<2x32xf32>
    %cst_28 = arith.constant dense<0.000000e+00> : vector<2x32xf32>
    %54 = tpu.matmul %51, %6, %cst_28 {dimension_numbers = #tpu.dot_dimension_numbers<[1], [0], [0], [1], [0, 0, 1, 1], [], []>} : vector<2x32xf32>, vector<32x32xf32>, vector<2x32xf32> -> vector<2x32xf32>
    %55 = arith.addf %53, %54 : vector<2x32xf32>
    %56 = math.tanh %55 : vector<2x32xf32>
    %c0_29 = arith.constant 0 : index
    %c288 = arith.constant 288 : index
    %57 = vector.load %arg6[%c0_29, %c288] : memref<2x1024xf32, #tpu.memory_space<vmem>>, vector<2x32xf32>
    tpu.vector_store %arg6[%c0_29, %c288], %56 {strides = array<i32>} : memref<2x1024xf32, #tpu.memory_space<vmem>>, vector<2x32xf32>,
    %58 = vector.extract_strided_slice %5 {offsets = [20, 0], sizes = [2, 32], strides = [1, 1]} : vector<64x32xf32> to vector<2x32xf32>
    %cst_30 = arith.constant dense<0.000000e+00> : vector<2x32xf32>
    %59 = tpu.matmul %56, %6, %cst_30 {dimension_numbers = #tpu.dot_dimension_numbers<[1], [0], [0], [1], [0, 0, 1, 1], [], []>} : vector<2x32xf32>, vector<32x32xf32>, vector<2x32xf32> -> vector<2x32xf32>
    %60 = arith.addf %58, %59 : vector<2x32xf32>
    %61 = math.tanh %60 : vector<2x32xf32>
    %c0_31 = arith.constant 0 : index
    %c320 = arith.constant 320 : index
    %62 = vector.load %arg6[%c0_31, %c320] : memref<2x1024xf32, #tpu.memory_space<vmem>>, vector<2x32xf32>
    tpu.vector_store %arg6[%c0_31, %c320], %61 {strides = array<i32>} : memref<2x1024xf32, #tpu.memory_space<vmem>>, vector<2x32xf32>,
    %63 = vector.extract_strided_slice %5 {offsets = [22, 0], sizes = [2, 32], strides = [1, 1]} : vector<64x32xf32> to vector<2x32xf32>
    %cst_32 = arith.constant dense<0.000000e+00> : vector<2x32xf32>
    %64 = tpu.matmul %61, %6, %cst_32 {dimension_numbers = #tpu.dot_dimension_numbers<[1], [0], [0], [1], [0, 0, 1, 1], [], []>} : vector<2x32xf32>, vector<32x32xf32>, vector<2x32xf32> -> vector<2x32xf32>
    %65 = arith.addf %63, %64 : vector<2x32xf32>
    %66 = math.tanh %65 : vector<2x32xf32>
    %c0_33 = arith.constant 0 : index
    %c352 = arith.constant 352 : index
    %67 = vector.load %arg6[%c0_33, %c352] : memref<2x1024xf32, #tpu.memory_space<vmem>>, vector<2x32xf32>
    tpu.vector_store %arg6[%c0_33, %c352], %66 {strides = array<i32>} : memref<2x1024xf32, #tpu.memory_space<vmem>>, vector<2x32xf32>,
    %68 = vector.extract_strided_slice %5 {offsets = [24, 0], sizes = [2, 32], strides = [1, 1]} : vector<64x32xf32> to vector<2x32xf32>
    %cst_34 = arith.constant dense<0.000000e+00> : vector<2x32xf32>
    %69 = tpu.matmul %66, %6, %cst_34 {dimension_numbers = #tpu.dot_dimension_numbers<[1], [0], [0], [1], [0, 0, 1, 1], [], []>} : vector<2x32xf32>, vector<32x32xf32>, vector<2x32xf32> -> vector<2x32xf32>
    %70 = arith.addf %68, %69 : vector<2x32xf32>
    %71 = math.tanh %70 : vector<2x32xf32>
    %c0_35 = arith.constant 0 : index
    %c384 = arith.constant 384 : index
    %72 = vector.load %arg6[%c0_35, %c384] : memref<2x1024xf32, #tpu.memory_space<vmem>>, vector<2x32xf32>
    tpu.vector_store %arg6[%c0_35, %c384], %71 {strides = array<i32>} : memref<2x1024xf32, #tpu.memory_space<vmem>>, vector<2x32xf32>,
    %73 = vector.extract_strided_slice %5 {offsets = [26, 0], sizes = [2, 32], strides = [1, 1]} : vector<64x32xf32> to vector<2x32xf32>
    %cst_36 = arith.constant dense<0.000000e+00> : vector<2x32xf32>
    %74 = tpu.matmul %71, %6, %cst_36 {dimension_numbers = #tpu.dot_dimension_numbers<[1], [0], [0], [1], [0, 0, 1, 1], [], []>} : vector<2x32xf32>, vector<32x32xf32>, vector<2x32xf32> -> vector<2x32xf32>
    %75 = arith.addf %73, %74 : vector<2x32xf32>
    %76 = math.tanh %75 : vector<2x32xf32>
    %c0_37 = arith.constant 0 : index
    %c416 = arith.constant 416 : index
    %77 = vector.load %arg6[%c0_37, %c416] : memref<2x1024xf32, #tpu.memory_space<vmem>>, vector<2x32xf32>
    tpu.vector_store %arg6[%c0_37, %c416], %76 {strides = array<i32>} : memref<2x1024xf32, #tpu.memory_space<vmem>>, vector<2x32xf32>,
    %78 = vector.extract_strided_slice %5 {offsets = [28, 0], sizes = [2, 32], strides = [1, 1]} : vector<64x32xf32> to vector<2x32xf32>
    %cst_38 = arith.constant dense<0.000000e+00> : vector<2x32xf32>
    %79 = tpu.matmul %76, %6, %cst_38 {dimension_numbers = #tpu.dot_dimension_numbers<[1], [0], [0], [1], [0, 0, 1, 1], [], []>} : vector<2x32xf32>, vector<32x32xf32>, vector<2x32xf32> -> vector<2x32xf32>
    %80 = arith.addf %78, %79 : vector<2x32xf32>
    %81 = math.tanh %80 : vector<2x32xf32>
    %c0_39 = arith.constant 0 : index
    %c448 = arith.constant 448 : index
    %82 = vector.load %arg6[%c0_39, %c448] : memref<2x1024xf32, #tpu.memory_space<vmem>>, vector<2x32xf32>
    tpu.vector_store %arg6[%c0_39, %c448], %81 {strides = array<i32>} : memref<2x1024xf32, #tpu.memory_space<vmem>>, vector<2x32xf32>,
    %83 = vector.extract_strided_slice %5 {offsets = [30, 0], sizes = [2, 32], strides = [1, 1]} : vector<64x32xf32> to vector<2x32xf32>
    %cst_40 = arith.constant dense<0.000000e+00> : vector<2x32xf32>
    %84 = tpu.matmul %81, %6, %cst_40 {dimension_numbers = #tpu.dot_dimension_numbers<[1], [0], [0], [1], [0, 0, 1, 1], [], []>} : vector<2x32xf32>, vector<32x32xf32>, vector<2x32xf32> -> vector<2x32xf32>
    %85 = arith.addf %83, %84 : vector<2x32xf32>
    %86 = math.tanh %85 : vector<2x32xf32>
    %c0_41 = arith.constant 0 : index
    %c480 = arith.constant 480 : index
    %87 = vector.load %arg6[%c0_41, %c480] : memref<2x1024xf32, #tpu.memory_space<vmem>>, vector<2x32xf32>
    tpu.vector_store %arg6[%c0_41, %c480], %86 {strides = array<i32>} : memref<2x1024xf32, #tpu.memory_space<vmem>>, vector<2x32xf32>,
    %88 = vector.extract_strided_slice %5 {offsets = [32, 0], sizes = [2, 32], strides = [1, 1]} : vector<64x32xf32> to vector<2x32xf32>
    %cst_42 = arith.constant dense<0.000000e+00> : vector<2x32xf32>
    %89 = tpu.matmul %86, %6, %cst_42 {dimension_numbers = #tpu.dot_dimension_numbers<[1], [0], [0], [1], [0, 0, 1, 1], [], []>} : vector<2x32xf32>, vector<32x32xf32>, vector<2x32xf32> -> vector<2x32xf32>
    %90 = arith.addf %88, %89 : vector<2x32xf32>
    %91 = math.tanh %90 : vector<2x32xf32>
    %c0_43 = arith.constant 0 : index
    %c512 = arith.constant 512 : index
    %92 = vector.load %arg6[%c0_43, %c512] : memref<2x1024xf32, #tpu.memory_space<vmem>>, vector<2x32xf32>
    tpu.vector_store %arg6[%c0_43, %c512], %91 {strides = array<i32>} : memref<2x1024xf32, #tpu.memory_space<vmem>>, vector<2x32xf32>,
    %93 = vector.extract_strided_slice %5 {offsets = [34, 0], sizes = [2, 32], strides = [1, 1]} : vector<64x32xf32> to vector<2x32xf32>
    %cst_44 = arith.constant dense<0.000000e+00> : vector<2x32xf32>
    %94 = tpu.matmul %91, %6, %cst_44 {dimension_numbers = #tpu.dot_dimension_numbers<[1], [0], [0], [1], [0, 0, 1, 1], [], []>} : vector<2x32xf32>, vector<32x32xf32>, vector<2x32xf32> -> vector<2x32xf32>
    %95 = arith.addf %93, %94 : vector<2x32xf32>
    %96 = math.tanh %95 : vector<2x32xf32>
    %c0_45 = arith.constant 0 : index
    %c544 = arith.constant 544 : index
    %97 = vector.load %arg6[%c0_45, %c544] : memref<2x1024xf32, #tpu.memory_space<vmem>>, vector<2x32xf32>
    tpu.vector_store %arg6[%c0_45, %c544], %96 {strides = array<i32>} : memref<2x1024xf32, #tpu.memory_space<vmem>>, vector<2x32xf32>,
    %98 = vector.extract_strided_slice %5 {offsets = [36, 0], sizes = [2, 32], strides = [1, 1]} : vector<64x32xf32> to vector<2x32xf32>
    %cst_46 = arith.constant dense<0.000000e+00> : vector<2x32xf32>
    %99 = tpu.matmul %96, %6, %cst_46 {dimension_numbers = #tpu.dot_dimension_numbers<[1], [0], [0], [1], [0, 0, 1, 1], [], []>} : vector<2x32xf32>, vector<32x32xf32>, vector<2x32xf32> -> vector<2x32xf32>
    %100 = arith.addf %98, %99 : vector<2x32xf32>
    %101 = math.tanh %100 : vector<2x32xf32>
    %c0_47 = arith.constant 0 : index
    %c576 = arith.constant 576 : index
    %102 = vector.load %arg6[%c0_47, %c576] : memref<2x1024xf32, #tpu.memory_space<vmem>>, vector<2x32xf32>
    tpu.vector_store %arg6[%c0_47, %c576], %101 {strides = array<i32>} : memref<2x1024xf32, #tpu.memory_space<vmem>>, vector<2x32xf32>,
    %103 = vector.extract_strided_slice %5 {offsets = [38, 0], sizes = [2, 32], strides = [1, 1]} : vector<64x32xf32> to vector<2x32xf32>
    %cst_48 = arith.constant dense<0.000000e+00> : vector<2x32xf32>
    %104 = tpu.matmul %101, %6, %cst_48 {dimension_numbers = #tpu.dot_dimension_numbers<[1], [0], [0], [1], [0, 0, 1, 1], [], []>} : vector<2x32xf32>, vector<32x32xf32>, vector<2x32xf32> -> vector<2x32xf32>
    %105 = arith.addf %103, %104 : vector<2x32xf32>
    %106 = math.tanh %105 : vector<2x32xf32>
    %c0_49 = arith.constant 0 : index
    %c608 = arith.constant 608 : index
    %107 = vector.load %arg6[%c0_49, %c608] : memref<2x1024xf32, #tpu.memory_space<vmem>>, vector<2x32xf32>
    tpu.vector_store %arg6[%c0_49, %c608], %106 {strides = array<i32>} : memref<2x1024xf32, #tpu.memory_space<vmem>>, vector<2x32xf32>,
    %108 = vector.extract_strided_slice %5 {offsets = [40, 0], sizes = [2, 32], strides = [1, 1]} : vector<64x32xf32> to vector<2x32xf32>
    %cst_50 = arith.constant dense<0.000000e+00> : vector<2x32xf32>
    %109 = tpu.matmul %106, %6, %cst_50 {dimension_numbers = #tpu.dot_dimension_numbers<[1], [0], [0], [1], [0, 0, 1, 1], [], []>} : vector<2x32xf32>, vector<32x32xf32>, vector<2x32xf32> -> vector<2x32xf32>
    %110 = arith.addf %108, %109 : vector<2x32xf32>
    %111 = math.tanh %110 : vector<2x32xf32>
    %c0_51 = arith.constant 0 : index
    %c640 = arith.constant 640 : index
    %112 = vector.load %arg6[%c0_51, %c640] : memref<2x1024xf32, #tpu.memory_space<vmem>>, vector<2x32xf32>
    tpu.vector_store %arg6[%c0_51, %c640], %111 {strides = array<i32>} : memref<2x1024xf32, #tpu.memory_space<vmem>>, vector<2x32xf32>,
    %113 = vector.extract_strided_slice %5 {offsets = [42, 0], sizes = [2, 32], strides = [1, 1]} : vector<64x32xf32> to vector<2x32xf32>
    %cst_52 = arith.constant dense<0.000000e+00> : vector<2x32xf32>
    %114 = tpu.matmul %111, %6, %cst_52 {dimension_numbers = #tpu.dot_dimension_numbers<[1], [0], [0], [1], [0, 0, 1, 1], [], []>} : vector<2x32xf32>, vector<32x32xf32>, vector<2x32xf32> -> vector<2x32xf32>
    %115 = arith.addf %113, %114 : vector<2x32xf32>
    %116 = math.tanh %115 : vector<2x32xf32>
    %c0_53 = arith.constant 0 : index
    %c672 = arith.constant 672 : index
    %117 = vector.load %arg6[%c0_53, %c672] : memref<2x1024xf32, #tpu.memory_space<vmem>>, vector<2x32xf32>
    tpu.vector_store %arg6[%c0_53, %c672], %116 {strides = array<i32>} : memref<2x1024xf32, #tpu.memory_space<vmem>>, vector<2x32xf32>,
    %118 = vector.extract_strided_slice %5 {offsets = [44, 0], sizes = [2, 32], strides = [1, 1]} : vector<64x32xf32> to vector<2x32xf32>
    %cst_54 = arith.constant dense<0.000000e+00> : vector<2x32xf32>
    %119 = tpu.matmul %116, %6, %cst_54 {dimension_numbers = #tpu.dot_dimension_numbers<[1], [0], [0], [1], [0, 0, 1, 1], [], []>} : vector<2x32xf32>, vector<32x32xf32>, vector<2x32xf32> -> vector<2x32xf32>
    %120 = arith.addf %118, %119 : vector<2x32xf32>
    %121 = math.tanh %120 : vector<2x32xf32>
    %c0_55 = arith.constant 0 : index
    %c704 = arith.constant 704 : index
    %122 = vector.load %arg6[%c0_55, %c704] : memref<2x1024xf32, #tpu.memory_space<vmem>>, vector<2x32xf32>
    tpu.vector_store %arg6[%c0_55, %c704], %121 {strides = array<i32>} : memref<2x1024xf32, #tpu.memory_space<vmem>>, vector<2x32xf32>,
    %123 = vector.extract_strided_slice %5 {offsets = [46, 0], sizes = [2, 32], strides = [1, 1]} : vector<64x32xf32> to vector<2x32xf32>
    %cst_56 = arith.constant dense<0.000000e+00> : vector<2x32xf32>
    %124 = tpu.matmul %121, %6, %cst_56 {dimension_numbers = #tpu.dot_dimension_numbers<[1], [0], [0], [1], [0, 0, 1, 1], [], []>} : vector<2x32xf32>, vector<32x32xf32>, vector<2x32xf32> -> vector<2x32xf32>
    %125 = arith.addf %123, %124 : vector<2x32xf32>
    %126 = math.tanh %125 : vector<2x32xf32>
    %c0_57 = arith.constant 0 : index
    %c736 = arith.constant 736 : index
    %127 = vector.load %arg6[%c0_57, %c736] : memref<2x1024xf32, #tpu.memory_space<vmem>>, vector<2x32xf32>
    tpu.vector_store %arg6[%c0_57, %c736], %126 {strides = array<i32>} : memref<2x1024xf32, #tpu.memory_space<vmem>>, vector<2x32xf32>,
    %128 = vector.extract_strided_slice %5 {offsets = [48, 0], sizes = [2, 32], strides = [1, 1]} : vector<64x32xf32> to vector<2x32xf32>
    %cst_58 = arith.constant dense<0.000000e+00> : vector<2x32xf32>
    %129 = tpu.matmul %126, %6, %cst_58 {dimension_numbers = #tpu.dot_dimension_numbers<[1], [0], [0], [1], [0, 0, 1, 1], [], []>} : vector<2x32xf32>, vector<32x32xf32>, vector<2x32xf32> -> vector<2x32xf32>
    %130 = arith.addf %128, %129 : vector<2x32xf32>
    %131 = math.tanh %130 : vector<2x32xf32>
    %c0_59 = arith.constant 0 : index
    %c768 = arith.constant 768 : index
    %132 = vector.load %arg6[%c0_59, %c768] : memref<2x1024xf32, #tpu.memory_space<vmem>>, vector<2x32xf32>
    tpu.vector_store %arg6[%c0_59, %c768], %131 {strides = array<i32>} : memref<2x1024xf32, #tpu.memory_space<vmem>>, vector<2x32xf32>,
    %133 = vector.extract_strided_slice %5 {offsets = [50, 0], sizes = [2, 32], strides = [1, 1]} : vector<64x32xf32> to vector<2x32xf32>
    %cst_60 = arith.constant dense<0.000000e+00> : vector<2x32xf32>
    %134 = tpu.matmul %131, %6, %cst_60 {dimension_numbers = #tpu.dot_dimension_numbers<[1], [0], [0], [1], [0, 0, 1, 1], [], []>} : vector<2x32xf32>, vector<32x32xf32>, vector<2x32xf32> -> vector<2x32xf32>
    %135 = arith.addf %133, %134 : vector<2x32xf32>
    %136 = math.tanh %135 : vector<2x32xf32>
    %c0_61 = arith.constant 0 : index
    %c800 = arith.constant 800 : index
    %137 = vector.load %arg6[%c0_61, %c800] : memref<2x1024xf32, #tpu.memory_space<vmem>>, vector<2x32xf32>
    tpu.vector_store %arg6[%c0_61, %c800], %136 {strides = array<i32>} : memref<2x1024xf32, #tpu.memory_space<vmem>>, vector<2x32xf32>,
    %138 = vector.extract_strided_slice %5 {offsets = [52, 0], sizes = [2, 32], strides = [1, 1]} : vector<64x32xf32> to vector<2x32xf32>
    %cst_62 = arith.constant dense<0.000000e+00> : vector<2x32xf32>
    %139 = tpu.matmul %136, %6, %cst_62 {dimension_numbers = #tpu.dot_dimension_numbers<[1], [0], [0], [1], [0, 0, 1, 1], [], []>} : vector<2x32xf32>, vector<32x32xf32>, vector<2x32xf32> -> vector<2x32xf32>
    %140 = arith.addf %138, %139 : vector<2x32xf32>
    %141 = math.tanh %140 : vector<2x32xf32>
    %c0_63 = arith.constant 0 : index
    %c832 = arith.constant 832 : index
    %142 = vector.load %arg6[%c0_63, %c832] : memref<2x1024xf32, #tpu.memory_space<vmem>>, vector<2x32xf32>
    tpu.vector_store %arg6[%c0_63, %c832], %141 {strides = array<i32>} : memref<2x1024xf32, #tpu.memory_space<vmem>>, vector<2x32xf32>,
    %143 = vector.extract_strided_slice %5 {offsets = [54, 0], sizes = [2, 32], strides = [1, 1]} : vector<64x32xf32> to vector<2x32xf32>
    %cst_64 = arith.constant dense<0.000000e+00> : vector<2x32xf32>
    %144 = tpu.matmul %141, %6, %cst_64 {dimension_numbers = #tpu.dot_dimension_numbers<[1], [0], [0], [1], [0, 0, 1, 1], [], []>} : vector<2x32xf32>, vector<32x32xf32>, vector<2x32xf32> -> vector<2x32xf32>
    %145 = arith.addf %143, %144 : vector<2x32xf32>
    %146 = math.tanh %145 : vector<2x32xf32>
    %c0_65 = arith.constant 0 : index
    %c864 = arith.constant 864 : index
    %147 = vector.load %arg6[%c0_65, %c864] : memref<2x1024xf32, #tpu.memory_space<vmem>>, vector<2x32xf32>
    tpu.vector_store %arg6[%c0_65, %c864], %146 {strides = array<i32>} : memref<2x1024xf32, #tpu.memory_space<vmem>>, vector<2x32xf32>,
    %148 = vector.extract_strided_slice %5 {offsets = [56, 0], sizes = [2, 32], strides = [1, 1]} : vector<64x32xf32> to vector<2x32xf32>
    %cst_66 = arith.constant dense<0.000000e+00> : vector<2x32xf32>
    %149 = tpu.matmul %146, %6, %cst_66 {dimension_numbers = #tpu.dot_dimension_numbers<[1], [0], [0], [1], [0, 0, 1, 1], [], []>} : vector<2x32xf32>, vector<32x32xf32>, vector<2x32xf32> -> vector<2x32xf32>
    %150 = arith.addf %148, %149 : vector<2x32xf32>
    %151 = math.tanh %150 : vector<2x32xf32>
    %c0_67 = arith.constant 0 : index
    %c896 = arith.constant 896 : index
    %152 = vector.load %arg6[%c0_67, %c896] : memref<2x1024xf32, #tpu.memory_space<vmem>>, vector<2x32xf32>
    tpu.vector_store %arg6[%c0_67, %c896], %151 {strides = array<i32>} : memref<2x1024xf32, #tpu.memory_space<vmem>>, vector<2x32xf32>,
    %153 = vector.extract_strided_slice %5 {offsets = [58, 0], sizes = [2, 32], strides = [1, 1]} : vector<64x32xf32> to vector<2x32xf32>
    %cst_68 = arith.constant dense<0.000000e+00> : vector<2x32xf32>
    %154 = tpu.matmul %151, %6, %cst_68 {dimension_numbers = #tpu.dot_dimension_numbers<[1], [0], [0], [1], [0, 0, 1, 1], [], []>} : vector<2x32xf32>, vector<32x32xf32>, vector<2x32xf32> -> vector<2x32xf32>
    %155 = arith.addf %153, %154 : vector<2x32xf32>
    %156 = math.tanh %155 : vector<2x32xf32>
    %c0_69 = arith.constant 0 : index
    %c928 = arith.constant 928 : index
    %157 = vector.load %arg6[%c0_69, %c928] : memref<2x1024xf32, #tpu.memory_space<vmem>>, vector<2x32xf32>
    tpu.vector_store %arg6[%c0_69, %c928], %156 {strides = array<i32>} : memref<2x1024xf32, #tpu.memory_space<vmem>>, vector<2x32xf32>,
    %158 = vector.extract_strided_slice %5 {offsets = [60, 0], sizes = [2, 32], strides = [1, 1]} : vector<64x32xf32> to vector<2x32xf32>
    %cst_70 = arith.constant dense<0.000000e+00> : vector<2x32xf32>
    %159 = tpu.matmul %156, %6, %cst_70 {dimension_numbers = #tpu.dot_dimension_numbers<[1], [0], [0], [1], [0, 0, 1, 1], [], []>} : vector<2x32xf32>, vector<32x32xf32>, vector<2x32xf32> -> vector<2x32xf32>
    %160 = arith.addf %158, %159 : vector<2x32xf32>
    %161 = math.tanh %160 : vector<2x32xf32>
    %c0_71 = arith.constant 0 : index
    %c960 = arith.constant 960 : index
    %162 = vector.load %arg6[%c0_71, %c960] : memref<2x1024xf32, #tpu.memory_space<vmem>>, vector<2x32xf32>
    tpu.vector_store %arg6[%c0_71, %c960], %161 {strides = array<i32>} : memref<2x1024xf32, #tpu.memory_space<vmem>>, vector<2x32xf32>,
    %163 = vector.extract_strided_slice %5 {offsets = [62, 0], sizes = [2, 32], strides = [1, 1]} : vector<64x32xf32> to vector<2x32xf32>
    %cst_72 = arith.constant dense<0.000000e+00> : vector<2x32xf32>
    %164 = tpu.matmul %161, %6, %cst_72 {dimension_numbers = #tpu.dot_dimension_numbers<[1], [0], [0], [1], [0, 0, 1, 1], [], []>} : vector<2x32xf32>, vector<32x32xf32>, vector<2x32xf32> -> vector<2x32xf32>
    %165 = arith.addf %163, %164 : vector<2x32xf32>
    %166 = math.tanh %165 : vector<2x32xf32>
    %c0_73 = arith.constant 0 : index
    %c992 = arith.constant 992 : index
    %167 = vector.load %arg6[%c0_73, %c992] : memref<2x1024xf32, #tpu.memory_space<vmem>>, vector<2x32xf32>
    tpu.vector_store %arg6[%c0_73, %c992], %166 {strides = array<i32>} : memref<2x1024xf32, #tpu.memory_space<vmem>>, vector<2x32xf32>,
    %c0_74 = arith.constant 0 : index
    %c0_75 = arith.constant 0 : index
    %168 = vector.load %arg7[%c0_74, %c0_75] : memref<2x32xf32, #tpu.memory_space<vmem>>, vector<2x32xf32>
    tpu.vector_store %arg7[%c0_74, %c0_75], %166 {strides = array<i32>} : memref<2x32xf32, #tpu.memory_space<vmem>>, vector<2x32xf32>,
    return
  }
  func.func @transform_0(%arg0: i32) -> (i32, i32) {
    %c0_i32 = arith.constant 0 : i32
    %c0_i32_0 = arith.constant 0 : i32
    %c0_i32_1 = arith.constant 0 : i32
    return %c0_i32, %c0_i32_0 : i32, i32
  }
  func.func @transform_1(%arg0: i32) -> (i32, i32) {
    %c0_i32 = arith.constant 0 : i32
    %c0_i32_0 = arith.constant 0 : i32
    %c0_i32_1 = arith.constant 0 : i32
    return %c0_i32, %c0_i32_0 : i32, i32
  }
  func.func @transform_2(%arg0: i32) -> (i32, i32) {
    %c0_i32 = arith.constant 0 : i32
    %c0_i32_0 = arith.constant 0 : i32
    %c0_i32_1 = arith.constant 0 : i32
    return %c0_i32, %c0_i32_0 : i32, i32
  }
  func.func @transform_3(%arg0: i32) -> (i32, i32) {
    %c0_i32 = arith.constant 0 : i32
    %c0_i32_0 = arith.constant 0 : i32
    %c0_i32_1 = arith.constant 0 : i32
    return %c0_i32, %c0_i32_0 : i32, i32
  }
  func.func @transform_4(%arg0: i32) -> (i32, i32) {
    %c0_i32 = arith.constant 0 : i32
    %c0_i32_0 = arith.constant 0 : i32
    %c0_i32_1 = arith.constant 0 : i32
    return %c0_i32, %c0_i32_0 : i32, i32
  }
  func.func @transform_5(%arg0: i32) -> (i32, i32) {
    %c0_i32 = arith.constant 0 : i32
    %c0_i32_0 = arith.constant 0 : i32
    %c0_i32_1 = arith.constant 0 : i32
    return %c0_i32, %c0_i32_0 : i32, i32
  }
  func.func @transform_6(%arg0: i32) -> (i32, i32) {
    %c0_i32 = arith.constant 0 : i32
    %c0_i32_0 = arith.constant 0 : i32
    %c0_i32_1 = arith.constant 0 : i32
    return %c0_i32, %c0_i32_0 : i32, i32
  }
}

</mosaic_0001>

<bundles_post_ra>
// kernel: rnn_forward.1
= control target key start
LH: loop header
LB: loop body
LE: loop exit
PB: predicated region body
PF: predicated region fallthrough
CT: control target
= control target key end

     0   :  { %vm39_vm0 = vcmask 64512   ;;  %v3673_v3 = vmov 0.0   ;;  %s4407_s0 = inlined_call_operand.vmem [shape: f32[64,8], index: 0, kind: input, shape index: {}]   ;;  %s4408_s1 = inlined_call_operand.vmem [shape: f32[8,32], index: 1, kind: input, shape index: {}]   ;;  %s4409_s2 = inlined_call_operand.vmem [shape: f32[32,32], index: 2, kind: input, shape index: {}]   ;;  %s4410_s3 = inlined_call_operand.vmem [shape: f32[1,32], index: 3, kind: input, shape index: {}]   ;;  %s4411_s4 = inlined_call_operand.vmem [shape: f32[2,32], index: 4, kind: input, shape index: {}]   ;;  %s4412_s5 = inlined_call_operand.vmem [shape: f32[2,1024], index: 5, kind: output, shape index: {0}]   ;;  %s4413_s6 = inlined_call_operand.hbm [shape: f32[2,32], index: 6, kind: output, shape index: {1}]  }
   0x1   :  { %v31_v0 = vld [vmem:[%s4408_s1] sm:$0xff]  ;;  %v3724_v2 = vld [vmem:[%s4409_s2 + $0x18] sm:$0xff]  ;;  %3223 = vmatprep.subr.mxu1 %v3673_v3  ;;  %v24_v4 = vld [vmem:[%s4407_s0 + $0x8] sm:$0xff] }
   0x2   :  { %v23_v1 = vld [vmem:[%s4407_s0] sm:$0xff]  ;;  %3209 = vmatprep.subr.mxu0 %v31_v0  ;;  %v3734_v5 = vld [vmem:[%s4409_s2 + $0x10] sm:$0xff] }
   0x3   :  { %3210 = vmatpush3.msra.mxu0 %v31_v0  ;;  %3211 = vmatprep.mubr.msk.f32.mxu0 %vm39_vm0, %v23_v1 }
   0x4   :  { %12 = vsyncpa [#allocation3], 0  ;;  %3224 = vmatpush3.msra.mxu1 %v3724_v2  ;;  %3212 = vmatmul.mubr.msk.f32.vlgmr.msra.gmra.mxu0 %vm39_vm0, %v24_v4  ;;  %v3742_v6 = vld [vmem:[%s4409_s2 + $0x8] sm:$0xff]  ;;  %vm3674_vm1 = vmmov 0   ;;  %v3752_v7 = vld [vmem:[%s4409_s2] sm:$0xff]  ;;  %vm174_vm2 = vcmask 261120   ;;  %v334_v29 = vlaneseq }
   0x5   :  { %3225 = vmatprep.subr.mxu1 %v3673_v3  ;;  %3231 = vmatprep.mubr.msk.f32.mxu1 %vm3674_vm1, %v3673_v3  ;;  %v173_v8 = vld [vmem:[%s4411_s4] sm:$0x3]  ;;  %vm250_vm3 = vcmask 254976   ;;  %v25_v17 = vld [vmem:[%s4407_s0 + $0x10] sm:$0xff]  ;;  %v26_v18 = vld [vmem:[%s4407_s0 + $0x18] sm:$0xff]  ;;  %vm342_vm4 = vcmask 517376  }
   0x6   :  { %3226 = vmatpush3.msra.mxu1 %v3734_v5  ;;  %3245 = vmatprep.subr.mxu0 %v3673_v3  ;;  %v3785_v10 = vld [vmem:[%s4410_s3] ss:$0 sm:$0xff]  ;;  %v28_v20 = vld [vmem:[%s4407_s0 + $0x28] sm:$0xff]  ;;  %v29_v21 = vld [vmem:[%s4407_s0 + $0x30] sm:$0xff]  ;;  %v3675_v27 = vmov 1983009808  }
   0x7   :  { %3227 = vmatprep.subr.mxu1 %v3673_v3  ;;  %3246 = vmatpush3.msra.mxu0 %v3724_v2  ;;  %v27_v19 = vld [vmem:[%s4407_s0 + $0x20] sm:$0xff]  ;;  %v30_v22 = vld [vmem:[%s4407_s0 + $0x38] sm:$0xff]  ;;  %v332_v28 = vunpack.c.l.s4 %v3675_v27  ;;  %v335_v31 = vshrl.u32 %v334_v29, 7  ;;  %s3676_s0 = smov 32   ;;  %s3677_s1 = smov 64   ;;  %vm434_vm5 = vcmask 779776  }
   0x8   :  { %3228 = vmatpush3.msra.mxu1 %v3742_v6  ;;  %3247 = vmatprep.subr.mxu0 %v3673_v3  ;;  %s3678_s7 = smov 96   ;;  %vm527_vm6 = vcmask 1042176   ;;  %s3679_s22 = smov [#allocation2]   ;;  %vm2979_vm7 = vcmask 261126  }
   0x9   :  { %3229 = vmatprep.subr.mxu1 %v3673_v3  ;;  %3248 = vmatpush3.msra.mxu0 %v3734_v5  ;;  %v333_v30 = vunpack.c.0.s8 %v332_v28  ;;  %s2989_s23 = sshll.u32 %s3679_s22, 4  ;;  %s2990_s23 = int_to_ptr.vmem [resolvable:$true] %s2989_s23 }
   0xa   :  { %3230 = vmatpush3.msra.mxu1 %v3752_v7  ;;  %3249 = vmatprep.subr.mxu0 %v3673_v3  ;;  %s3651_s24 = scalar_lea.vmem %s2990_s23, 32  ;;  %p3656_p1 = scmp.lt.s32.totalorder %s2990_s23, %s2990_s23 }
   0xb   :  { %3232 = vmatmul.mubr.msk.f32.vlgmr.msra.gmra.mxu1 %vm174_vm2, %v173_v8  ;;  %3234 = vmatprep.subr.mxu1 %v3673_v3  ;;  %v3833_v32 = vsub.s32 %v333_v30, %v335_v31  ;;  %p3652_p0 = scmp.ne.s32.totalorder %s2990_s23, %s3651_s24  ;;  %p3657_p2 = scmp.lt.s32.totalorder %s3651_s24, %s3651_s24 }
   0xc   :  { %3235 = vmatpush3.msra.mxu1 %v3724_v2  ;;  %3242 = vmatprep.mubr.msk.f32.mxu1 %vm3674_vm1, %v3673_v3 }
   0xd   :  { %3236 = vmatprep.subr.mxu1 %v3673_v3  ;;  %3250 = vmatpush3.msra.mxu0 %v3742_v6  ;;  %p3658_p3 = por %p3657_p2, %p3656_p1 }
   0xe   :  { %3237 = vmatpush3.msra.mxu1 %v3734_v5  ;;  %3251 = vmatprep.subr.mxu0 %v3673_v3 }
   0xf   :  { %3238 = vmatprep.subr.mxu1 %v3673_v3  ;;  %3252 = vmatpush3.msra.mxu0 %v3752_v7  ;;  %p3659_p4 = pnand %p3658_p3, %p3652_p0 }
  0x10   :  { %3239 = vmatpush3.msra.mxu1 %v3742_v6  ;;  %3267 = vmatprep.subr.mxu0 %v3673_v3 }
  0x11   :  { %3240 = vmatprep.subr.mxu1 %v3673_v3  ;;  %3214 = vmatprep.mubr.msk.f32.mxu0 %vm39_vm0, %v25_v17 }
  0x12   :  { %3241 = vmatpush3.msra.mxu1 %v3752_v7  ;;  %3215 = vmatmul.mubr.msk.f32.gmra.mxu0 %vm39_vm0, %v26_v18 }
  0x13   :  { %3256 = vmatprep.subr.mxu1 %v3673_v3  ;;  %3217 = vmatprep.mubr.msk.f32.mxu0 %vm39_vm0, %v27_v19 }
  0x16   :  { %3218 = vmatmul.mubr.msk.f32.gmra.mxu0 %vm39_vm0, %v28_v20 }
  0x17   :  { %3220 = vmatprep.mubr.msk.f32.mxu0 %vm39_vm0, %v29_v21 }
  0x1a   :  { %3221 = vmatmul.mubr.msk.f32.gmra.mxu0 %vm39_vm0, %v30_v22 }
  0x1b   :  { %3253 = vmatprep.mubr.msk.f32.mxu0 %vm3674_vm1, %v3673_v3 }
  0xc4   :  { %v3780_v9 = vpop.f32.mrf.mxu0 }
  0xc5   :  { %v3902_v63 = vadd.f32 %v3780_v9, %v3785_v10 }
  0xc6   :  { %v130_v11 = vpop.f32.mrf.mxu0 }
  0xc7   :  { %v3788_v12 = vadd.f32 %v3785_v10, %v130_v11 }
  0xcb   :  { %v244_v13 = vpop.f32.mrf.mxu1 }
  0xcc   :  { %v248_v14 = vadd.f32 %v244_v13, %v3788_v12 }
  0xcd   :  { %v3233_v15 = vpop.f32.mrf.mxu1 }
  0xce   :  { %3582 = vtanh.f32 %v248_v14 }
  0xd2   :  { %v3852_v38 = vpop.f32.mrf.mxu0 }
  0xd4   :  { %v3854_v39 = vpop.f32.mrf.mxu0 }
  0xd6   :  { %v3856_v40 = vpop.f32.mrf.mxu0 }
  0xd8   :  { %v3858_v41 = vpop.f32.mrf.mxu0 }
  0xda   :  { %v3860_v42 = vpop.f32.mrf.mxu0 }
  0xdb   :  { %v3583_v16 = vpop.eup %3582 }
  0xdc   :  { %3243 = vmatmul.mubr.msk.f32.vlgmr.msra.gmra.mxu1 %vm174_vm2, %v3583_v16  ;;  %251 = vst.msk [vmem:[%s4412_s5] sm:$0x3] %vm250_vm3, %v3583_v16  ;;  %v3862_v43 = vpop.f32.mrf.mxu0 }
  0xdd   :  { %3257 = vmatpush3.msra.mxu1 %v3724_v2  ;;  %3264 = vmatprep.mubr.msk.f32.mxu1 %vm3674_vm1, %v3673_v3 }
  0xde   :  { %3258 = vmatprep.subr.mxu1 %v3673_v3 }
  0xdf   :  { %3259 = vmatpush3.msra.mxu1 %v3734_v5 }
  0xe0   :  { %3260 = vmatprep.subr.mxu1 %v3673_v3 }
  0xe1   :  { %3261 = vmatpush3.msra.mxu1 %v3742_v6 }
  0xe2   :  { %3262 = vmatprep.subr.mxu1 %v3673_v3 }
  0xe3   :  { %3263 = vmatpush3.msra.mxu1 %v3752_v7 }
  0xe4   :  { %3278 = vmatprep.subr.mxu1 %v3673_v3 }
 0x19c   :  { %v321_v23 = vpop.f32.mrf.mxu1 }
 0x19d   :  { %v326_v24 = vrot.slane %v321_v23, 6 }
 0x19e   :  { %v3244_v25 = vpop.f32.mrf.mxu1 }
 0x19f   :  { %v328_v26 = vadd.f32 %v326_v24, %v3788_v12 }
 0x1a1   :  { %3584 = vtanh.f32 %v328_v26 }
 0x1ae   :  { %v3585_v33 = vpop.eup %3584 }
 0x1af   :  { %v344_v34 = vrot.slane %v3585_v33, 2  ;;  %v337_v35 = vrot.slane %v3585_v33, %v3833_v32 }
 0x1b1   :  { %3254 = vmatmul.mubr.msk.f32.vlgmr.msra.gmra.mxu0 %vm174_vm2, %v344_v34  ;;  %v338_v36 = vcombine.high %v337_v35, %v337_v35 }
 0x1b2   :  { %3268 = vmatpush3.msra.mxu0 %v3724_v2  ;;  %3275 = vmatprep.mubr.msk.f32.mxu0 %vm3674_vm1, %v3673_v3 }
 0x1b3   :  { %339 = vrot.lane.b32.xlu0 %v338_v36, %s3676_s0  ;;  %3269 = vmatprep.subr.mxu0 %v3673_v3 }
 0x1b4   :  { %3270 = vmatpush3.msra.mxu0 %v3734_v5 }
 0x1b5   :  { %3271 = vmatprep.subr.mxu0 %v3673_v3 }
 0x1b6   :  { %3272 = vmatpush3.msra.mxu0 %v3742_v6 }
 0x1b7   :  { %3273 = vmatprep.subr.mxu0 %v3673_v3 }
 0x1b8   :  { %3274 = vmatpush3.msra.mxu0 %v3752_v7 }
 0x1b9   :  { %3289 = vmatprep.subr.mxu0 %v3673_v3 }
 0x225   :  { %v340_v37 = vpop.permute.xlu0 %339 }
 0x226   :  { %343 = vst.msk [vmem:[%s4412_s5] sm:$0x3] %vm342_vm4, %v340_v37 }
 0x271   :  { %v413_v44 = vpop.f32.mrf.mxu0 }
 0x272   :  { %v418_v45 = vrot.slane %v413_v44, 4 }
 0x273   :  { %v3255_v46 = vpop.f32.mrf.mxu0 }
 0x274   :  { %v420_v47 = vadd.f32 %v418_v45, %v3788_v12  ;;  %v3976_v45 = vadd.f32 %v3785_v10, %v3854_v39 }
 0x276   :  { %3586 = vtanh.f32 %v420_v47 }
 0x283   :  { %v3587_v48 = vpop.eup %3586 }
 0x284   :  { %v436_v49 = vrot.slane %v3587_v48, 4  ;;  %v423_v50 = vcombine.high %v3587_v48, %v3587_v48 }
 0x286   :  { %3265 = vmatmul.mubr.msk.f32.vlgmr.msra.gmra.mxu1 %vm174_vm2, %v436_v49  ;;  %v430_v51 = vrot.slane %v423_v50, %v3833_v32 }
 0x287   :  { %3279 = vmatpush3.msra.mxu1 %v3724_v2  ;;  %3286 = vmatprep.mubr.msk.f32.mxu1 %vm3674_vm1, %v3673_v3 }
 0x288   :  { %431 = vrot.lane.b32.xlu0 %v430_v51, %s3677_s1  ;;  %3280 = vmatprep.subr.mxu1 %v3673_v3 }
 0x289   :  { %3281 = vmatpush3.msra.mxu1 %v3734_v5 }
 0x28a   :  { %3282 = vmatprep.subr.mxu1 %v3673_v3 }
 0x28b   :  { %3283 = vmatpush3.msra.mxu1 %v3742_v6 }
 0x28c   :  { %3284 = vmatprep.subr.mxu1 %v3673_v3 }
 0x28d   :  { %3285 = vmatpush3.msra.mxu1 %v3752_v7 }
 0x28e   :  { %3300 = vmatprep.subr.mxu1 %v3673_v3 }
 0x2fa   :  { %v432_v52 = vpop.permute.xlu0 %431 }
 0x2fb   :  { %435 = vst.msk [vmem:[%s4412_s5] sm:$0x3] %vm434_vm5, %v432_v52 }
 0x346   :  { %v505_v53 = vpop.f32.mrf.mxu1 }
 0x347   :  { %v510_v54 = vrot.slane %v505_v53, 2 }
 0x348   :  { %v3266_v55 = vpop.f32.mrf.mxu1 }
 0x349   :  { %v512_v56 = vadd.f32 %v510_v54, %v3788_v12 }
 0x34b   :  { %3588 = vtanh.f32 %v512_v56 }
 0x358   :  { %v3589_v57 = vpop.eup %3588 }
 0x359   :  { %v529_v58 = vrot.slane %v3589_v57, 6  ;;  %v515_v59 = vcombine.high %v3589_v57, %v3589_v57 }
 0x35b   :  { %3276 = vmatmul.mubr.msk.f32.vlgmr.msra.gmra.mxu0 %vm174_vm2, %v529_v58  ;;  %v522_v60 = vrot.slane %v515_v59, %v3833_v32 }
 0x35c   :  { %3290 = vmatpush3.msra.mxu0 %v3724_v2  ;;  %3297 = vmatprep.mubr.msk.f32.mxu0 %vm3674_vm1, %v3673_v3 }
 0x35d   :  { %v523_v61 = vcombine.high %v522_v60, %v522_v60  ;;  %3291 = vmatprep.subr.mxu0 %v3673_v3 }
 0x35e   :  { %3292 = vmatpush3.msra.mxu0 %v3734_v5 }
 0x35f   :  { %524 = vrot.lane.b32.xlu0 %v523_v61, %s3678_s7  ;;  %3293 = vmatprep.subr.mxu0 %v3673_v3 }
 0x360   :  { %3294 = vmatpush3.msra.mxu0 %v3742_v6 }
 0x361   :  { %3295 = vmatprep.subr.mxu0 %v3673_v3 }
 0x362   :  { %3296 = vmatpush3.msra.mxu0 %v3752_v7 }
 0x363   :  { %3311 = vmatprep.subr.mxu0 %v3673_v3 }
 0x3d1   :  { %v525_v62 = vpop.permute.xlu0 %524 }
 0x3d2   :  { %528 = vst.msk [vmem:[%s4412_s5] sm:$0x3] %vm527_vm6, %v525_v62 }
 0x41b   :  { %v598_v0 = vpop.f32.mrf.mxu0 }
 0x41c   :  { %v602_v1 = vadd.f32 %v598_v0, %v3902_v63 }
 0x41d   :  { %v3277_v4 = vpop.f32.mrf.mxu0 }
 0x41e   :  { %3590 = vtanh.f32 %v602_v1 }
 0x42b   :  { %v3591_v8 = vpop.eup %3590 }
 0x42c   :  { %604 = vst.msk [vmem:[%s4412_s5 + $0x2] sm:$0x3] %vm250_vm3, %v3591_v8  ;;  %3287 = vmatmul.mubr.msk.f32.vlgmr.msra.gmra.mxu1 %vm174_vm2, %v3591_v8 }
 0x42d   :  { %3301 = vmatpush3.msra.mxu1 %v3724_v2  ;;  %3308 = vmatprep.mubr.msk.f32.mxu1 %vm3674_vm1, %v3673_v3 }
 0x42e   :  { %3302 = vmatprep.subr.mxu1 %v3673_v3 }
 0x42f   :  { %3303 = vmatpush3.msra.mxu1 %v3734_v5 }
 0x430   :  { %3304 = vmatprep.subr.mxu1 %v3673_v3 }
 0x431   :  { %3305 = vmatpush3.msra.mxu1 %v3742_v6 }
 0x432   :  { %3306 = vmatprep.subr.mxu1 %v3673_v3 }
 0x433   :  { %3307 = vmatpush3.msra.mxu1 %v3752_v7 }
 0x434   :  { %3322 = vmatprep.subr.mxu1 %v3673_v3 }
 0x4ec   :  { %v674_v9 = vpop.f32.mrf.mxu1 }
 0x4ed   :  { %v679_v11 = vrot.slane %v674_v9, 6 }
 0x4ee   :  { %v3288_v12 = vpop.f32.mrf.mxu1 }
 0x4ef   :  { %v681_v13 = vadd.f32 %v679_v11, %v3902_v63 }
 0x4f1   :  { %3592 = vtanh.f32 %v681_v13 }
 0x4fe   :  { %v3593_v14 = vpop.eup %3592 }
 0x4ff   :  { %v696_v15 = vrot.slane %v3593_v14, 2  ;;  %v690_v16 = vrot.slane %v3593_v14, %v3833_v32 }
 0x501   :  { %3298 = vmatmul.mubr.msk.f32.vlgmr.msra.gmra.mxu0 %vm174_vm2, %v696_v15  ;;  %v691_v17 = vcombine.high %v690_v16, %v690_v16 }
 0x502   :  { %3312 = vmatpush3.msra.mxu0 %v3724_v2  ;;  %3319 = vmatprep.mubr.msk.f32.mxu0 %vm3674_vm1, %v3673_v3 }
 0x503   :  { %692 = vrot.lane.b32.xlu0 %v691_v17, %s3676_s0  ;;  %3313 = vmatprep.subr.mxu0 %v3673_v3 }
 0x504   :  { %3314 = vmatpush3.msra.mxu0 %v3734_v5 }
 0x505   :  { %3315 = vmatprep.subr.mxu0 %v3673_v3 }
 0x506   :  { %3316 = vmatpush3.msra.mxu0 %v3742_v6 }
 0x507   :  { %3317 = vmatprep.subr.mxu0 %v3673_v3 }
 0x508   :  { %3318 = vmatpush3.msra.mxu0 %v3752_v7 }
 0x509   :  { %3333 = vmatprep.subr.mxu0 %v3673_v3 }
 0x575   :  { %v693_v18 = vpop.permute.xlu0 %692 }
 0x576   :  { %695 = vst.msk [vmem:[%s4412_s5 + $0x2] sm:$0x3] %vm342_vm4, %v693_v18 }
 0x5c1   :  { %v765_v19 = vpop.f32.mrf.mxu0 }
 0x5c2   :  { %v770_v20 = vrot.slane %v765_v19, 4  ;;  %v4050_v19 = vadd.f32 %v3852_v38, %v3785_v10 }
 0x5c3   :  { %v3299_v21 = vpop.f32.mrf.mxu0 }
 0x5c4   :  { %v772_v22 = vadd.f32 %v770_v20, %v3902_v63 }
 0x5c6   :  { %3594 = vtanh.f32 %v772_v22 }
 0x5d3   :  { %v3595_v23 = vpop.eup %3594 }
 0x5d4   :  { %v787_v24 = vrot.slane %v3595_v23, 4  ;;  %v775_v25 = vcombine.high %v3595_v23, %v3595_v23 }
 0x5d6   :  { %3309 = vmatmul.mubr.msk.f32.vlgmr.msra.gmra.mxu1 %vm174_vm2, %v787_v24  ;;  %v782_v26 = vrot.slane %v775_v25, %v3833_v32 }
 0x5d7   :  { %3323 = vmatpush3.msra.mxu1 %v3724_v2  ;;  %3330 = vmatprep.mubr.msk.f32.mxu1 %vm3674_vm1, %v3673_v3 }
 0x5d8   :  { %783 = vrot.lane.b32.xlu1 %v782_v26, %s3677_s1  ;;  %3324 = vmatprep.subr.mxu1 %v3673_v3 }
 0x5d9   :  { %3325 = vmatpush3.msra.mxu1 %v3734_v5 }
 0x5da   :  { %3326 = vmatprep.subr.mxu1 %v3673_v3 }
 0x5db   :  { %3327 = vmatpush3.msra.mxu1 %v3742_v6 }
 0x5dc   :  { %3328 = vmatprep.subr.mxu1 %v3673_v3 }
 0x5dd   :  { %3329 = vmatpush3.msra.mxu1 %v3752_v7 }
 0x5de   :  { %3344 = vmatprep.subr.mxu1 %v3673_v3 }
 0x64a   :  { %v784_v27 = vpop.permute.xlu1 %783 }
 0x64b   :  { %786 = vst.msk [vmem:[%s4412_s5 + $0x2] sm:$0x3] %vm434_vm5, %v784_v27 }
 0x696   :  { %v856_v28 = vpop.f32.mrf.mxu1 }
 0x697   :  { %v861_v29 = vrot.slane %v856_v28, 2 }
 0x698   :  { %v3310_v30 = vpop.f32.mrf.mxu1 }
 0x699   :  { %v863_v31 = vadd.f32 %v861_v29, %v3902_v63 }
 0x69b   :  { %3596 = vtanh.f32 %v863_v31 }
 0x6a8   :  { %v3597_v33 = vpop.eup %3596 }
 0x6a9   :  { %v879_v34 = vrot.slane %v3597_v33, 6  ;;  %v866_v35 = vcombine.high %v3597_v33, %v3597_v33 }
 0x6ab   :  { %3320 = vmatmul.mubr.msk.f32.vlgmr.msra.gmra.mxu0 %vm174_vm2, %v879_v34  ;;  %v873_v36 = vrot.slane %v866_v35, %v3833_v32 }
 0x6ac   :  { %3334 = vmatpush3.msra.mxu0 %v3724_v2  ;;  %3341 = vmatprep.mubr.msk.f32.mxu0 %vm3674_vm1, %v3673_v3 }
 0x6ad   :  { %v874_v37 = vcombine.high %v873_v36, %v873_v36  ;;  %3335 = vmatprep.subr.mxu0 %v3673_v3 }
 0x6ae   :  { %3336 = vmatpush3.msra.mxu0 %v3734_v5 }
 0x6af   :  { %875 = vrot.lane.b32.xlu1 %v874_v37, %s3678_s7  ;;  %3337 = vmatprep.subr.mxu0 %v3673_v3 }
 0x6b0   :  { %3338 = vmatpush3.msra.mxu0 %v3742_v6 }
 0x6b1   :  { %3339 = vmatprep.subr.mxu0 %v3673_v3 }
 0x6b2   :  { %3340 = vmatpush3.msra.mxu0 %v3752_v7 }
 0x6b3   :  { %3355 = vmatprep.subr.mxu0 %v3673_v3 }
 0x721   :  { %v876_v44 = vpop.permute.xlu1 %875 }
 0x722   :  { %878 = vst.msk [vmem:[%s4412_s5 + $0x2] sm:$0x3] %vm527_vm6, %v876_v44 }
 0x76b   :  { %v948_v46 = vpop.f32.mrf.mxu0 }
 0x76c   :  { %v952_v47 = vadd.f32 %v948_v46, %v3976_v45 }
 0x76d   :  { %v3321_v48 = vpop.f32.mrf.mxu0 }
 0x76e   :  { %3598 = vtanh.f32 %v952_v47 }
 0x77b   :  { %v3599_v49 = vpop.eup %3598 }
 0x77c   :  { %954 = vst.msk [vmem:[%s4412_s5 + $0x4] sm:$0x3] %vm250_vm3, %v3599_v49  ;;  %3331 = vmatmul.mubr.msk.f32.vlgmr.msra.gmra.mxu1 %vm174_vm2, %v3599_v49 }
 0x77d   :  { %3345 = vmatpush3.msra.mxu1 %v3724_v2  ;;  %3352 = vmatprep.mubr.msk.f32.mxu1 %vm3674_vm1, %v3673_v3 }
 0x77e   :  { %3346 = vmatprep.subr.mxu1 %v3673_v3 }
 0x77f   :  { %3347 = vmatpush3.msra.mxu1 %v3734_v5 }
 0x780   :  { %3348 = vmatprep.subr.mxu1 %v3673_v3 }
 0x781   :  { %3349 = vmatpush3.msra.mxu1 %v3742_v6 }
 0x782   :  { %3350 = vmatprep.subr.mxu1 %v3673_v3 }
 0x783   :  { %3351 = vmatpush3.msra.mxu1 %v3752_v7 }
 0x784   :  { %3366 = vmatprep.subr.mxu1 %v3673_v3 }
 0x83c   :  { %v1024_v39 = vpop.f32.mrf.mxu1 }
 0x83d   :  { %v1029_v50 = vrot.slane %v1024_v39, 6 }
 0x83e   :  { %v3332_v51 = vpop.f32.mrf.mxu1 }
 0x83f   :  { %v1031_v52 = vadd.f32 %v1029_v50, %v3976_v45 }
 0x841   :  { %3600 = vtanh.f32 %v1031_v52 }
 0x84e   :  { %v3601_v53 = vpop.eup %3600 }
 0x84f   :  { %v1046_v54 = vrot.slane %v3601_v53, 2  ;;  %v1040_v55 = vrot.slane %v3601_v53, %v3833_v32 }
 0x851   :  { %3342 = vmatmul.mubr.msk.f32.vlgmr.msra.gmra.mxu0 %vm174_vm2, %v1046_v54  ;;  %v1041_v56 = vcombine.high %v1040_v55, %v1040_v55 }
 0x852   :  { %3356 = vmatpush3.msra.mxu0 %v3724_v2  ;;  %3363 = vmatprep.mubr.msk.f32.mxu0 %vm3674_vm1, %v3673_v3 }
 0x853   :  { %1042 = vrot.lane.b32.xlu1 %v1041_v56, %s3676_s0  ;;  %3357 = vmatprep.subr.mxu0 %v3673_v3 }
 0x854   :  { %3358 = vmatpush3.msra.mxu0 %v3734_v5 }
 0x855   :  { %3359 = vmatprep.subr.mxu0 %v3673_v3 }
 0x856   :  { %3360 = vmatpush3.msra.mxu0 %v3742_v6 }
 0x857   :  { %3361 = vmatprep.subr.mxu0 %v3673_v3 }
 0x858   :  { %3362 = vmatpush3.msra.mxu0 %v3752_v7 }
 0x859   :  { %3377 = vmatprep.subr.mxu0 %v3673_v3 }
 0x8c5   :  { %v1043_v57 = vpop.permute.xlu1 %1042 }
 0x8c6   :  { %1045 = vst.msk [vmem:[%s4412_s5 + $0x4] sm:$0x3] %vm342_vm4, %v1043_v57  ;;  %v4124_v57 = vadd.f32 %v3785_v10, %v3858_v41 }
 0x911   :  { %v1115_v58 = vpop.f32.mrf.mxu0 }
 0x912   :  { %v1120_v59 = vrot.slane %v1115_v58, 4 }
 0x913   :  { %v3343_v60 = vpop.f32.mrf.mxu0 }
 0x914   :  { %v1122_v61 = vadd.f32 %v1120_v59, %v3976_v45 }
 0x916   :  { %3602 = vtanh.f32 %v1122_v61 }
 0x923   :  { %v3603_v62 = vpop.eup %3602 }
 0x924   :  { %v1137_v63 = vrot.slane %v3603_v62, 4  ;;  %v1125_v0 = vcombine.high %v3603_v62, %v3603_v62 }
 0x926   :  { %3353 = vmatmul.mubr.msk.f32.vlgmr.msra.gmra.mxu1 %vm174_vm2, %v1137_v63  ;;  %v1132_v1 = vrot.slane %v1125_v0, %v3833_v32 }
 0x927   :  { %3367 = vmatpush3.msra.mxu1 %v3724_v2  ;;  %3374 = vmatprep.mubr.msk.f32.mxu1 %vm3674_vm1, %v3673_v3 }
 0x928   :  { %1133 = vrot.lane.b32.xlu0 %v1132_v1, %s3677_s1  ;;  %3368 = vmatprep.subr.mxu1 %v3673_v3 }
 0x929   :  { %3369 = vmatpush3.msra.mxu1 %v3734_v5 }
 0x92a   :  { %3370 = vmatprep.subr.mxu1 %v3673_v3 }
 0x92b   :  { %3371 = vmatpush3.msra.mxu1 %v3742_v6 }
 0x92c   :  { %3372 = vmatprep.subr.mxu1 %v3673_v3 }
 0x92d   :  { %3373 = vmatpush3.msra.mxu1 %v3752_v7 }
 0x92e   :  { %3388 = vmatprep.subr.mxu1 %v3673_v3 }
 0x99a   :  { %v1134_v4 = vpop.permute.xlu0 %1133 }
 0x99b   :  { %1136 = vst.msk [vmem:[%s4412_s5 + $0x4] sm:$0x3] %vm434_vm5, %v1134_v4 }
 0x9e6   :  { %v1206_v8 = vpop.f32.mrf.mxu1 }
 0x9e7   :  { %v1211_v9 = vrot.slane %v1206_v8, 2 }
 0x9e8   :  { %v3354_v11 = vpop.f32.mrf.mxu1 }
 0x9e9   :  { %v1213_v12 = vadd.f32 %v1211_v9, %v3976_v45 }
 0x9eb   :  { %3604 = vtanh.f32 %v1213_v12 }
 0x9f8   :  { %v3605_v13 = vpop.eup %3604 }
 0x9f9   :  { %v1229_v14 = vrot.slane %v3605_v13, 6  ;;  %v1216_v15 = vcombine.high %v3605_v13, %v3605_v13 }
 0x9fb   :  { %3364 = vmatmul.mubr.msk.f32.vlgmr.msra.gmra.mxu0 %vm174_vm2, %v1229_v14  ;;  %v1223_v16 = vrot.slane %v1216_v15, %v3833_v32 }
 0x9fc   :  { %3378 = vmatpush3.msra.mxu0 %v3724_v2  ;;  %3385 = vmatprep.mubr.msk.f32.mxu0 %vm3674_vm1, %v3673_v3 }
 0x9fd   :  { %v1224_v17 = vcombine.high %v1223_v16, %v1223_v16  ;;  %3379 = vmatprep.subr.mxu0 %v3673_v3 }
 0x9fe   :  { %3380 = vmatpush3.msra.mxu0 %v3734_v5 }
 0x9ff   :  { %1225 = vrot.lane.b32.xlu0 %v1224_v17, %s3678_s7  ;;  %3381 = vmatprep.subr.mxu0 %v3673_v3 }
 0xa00   :  { %3382 = vmatpush3.msra.mxu0 %v3742_v6 }
 0xa01   :  { %3383 = vmatprep.subr.mxu0 %v3673_v3 }
 0xa02   :  { %3384 = vmatpush3.msra.mxu0 %v3752_v7 }
 0xa03   :  { %3399 = vmatprep.subr.mxu0 %v3673_v3 }
 0xa71   :  { %v1226_v18 = vpop.permute.xlu0 %1225 }
 0xa72   :  { %1228 = vst.msk [vmem:[%s4412_s5 + $0x4] sm:$0x3] %vm527_vm6, %v1226_v18 }
 0xabb   :  { %v1298_v20 = vpop.f32.mrf.mxu0 }
 0xabc   :  { %v1302_v21 = vadd.f32 %v1298_v20, %v4050_v19 }
 0xabd   :  { %v3365_v22 = vpop.f32.mrf.mxu0 }
 0xabe   :  { %3606 = vtanh.f32 %v1302_v21 }
 0xacb   :  { %v3607_v23 = vpop.eup %3606 }
 0xacc   :  { %1304 = vst.msk [vmem:[%s4412_s5 + $0x6] sm:$0x3] %vm250_vm3, %v3607_v23  ;;  %3375 = vmatmul.mubr.msk.f32.vlgmr.msra.gmra.mxu1 %vm174_vm2, %v3607_v23 }
 0xacd   :  { %3389 = vmatpush3.msra.mxu1 %v3724_v2  ;;  %3396 = vmatprep.mubr.msk.f32.mxu1 %vm3674_vm1, %v3673_v3 }
 0xace   :  { %3390 = vmatprep.subr.mxu1 %v3673_v3 }
 0xacf   :  { %3391 = vmatpush3.msra.mxu1 %v3734_v5 }
 0xad0   :  { %3392 = vmatprep.subr.mxu1 %v3673_v3 }
 0xad1   :  { %3393 = vmatpush3.msra.mxu1 %v3742_v6 }
 0xad2   :  { %3394 = vmatprep.subr.mxu1 %v3673_v3 }
 0xad3   :  { %3395 = vmatpush3.msra.mxu1 %v3752_v7 }
 0xad4   :  { %3410 = vmatprep.subr.mxu1 %v3673_v3 }
 0xb8c   :  { %v1374_v38 = vpop.f32.mrf.mxu1 }
 0xb8d   :  { %v1379_v24 = vrot.slane %v1374_v38, 6 }
 0xb8e   :  { %v3376_v25 = vpop.f32.mrf.mxu1 }
 0xb8f   :  { %v1381_v26 = vadd.f32 %v1379_v24, %v4050_v19 }
 0xb91   :  { %3608 = vtanh.f32 %v1381_v26 }
 0xb9e   :  { %v3609_v27 = vpop.eup %3608 }
 0xb9f   :  { %v1396_v28 = vrot.slane %v3609_v27, 2  ;;  %v1390_v29 = vrot.slane %v3609_v27, %v3833_v32 }
 0xba1   :  { %3386 = vmatmul.mubr.msk.f32.vlgmr.msra.gmra.mxu0 %vm174_vm2, %v1396_v28  ;;  %v1391_v30 = vcombine.high %v1390_v29, %v1390_v29 }
 0xba2   :  { %3400 = vmatpush3.msra.mxu0 %v3724_v2  ;;  %3407 = vmatprep.mubr.msk.f32.mxu0 %vm3674_vm1, %v3673_v3 }
 0xba3   :  { %1392 = vrot.lane.b32.xlu1 %v1391_v30, %s3676_s0  ;;  %3401 = vmatprep.subr.mxu0 %v3673_v3  ;;  %v4198_v30 = vadd.f32 %v3856_v40, %v3785_v10 }
 0xba4   :  { %3402 = vmatpush3.msra.mxu0 %v3734_v5 }
 0xba5   :  { %3403 = vmatprep.subr.mxu0 %v3673_v3 }
 0xba6   :  { %3404 = vmatpush3.msra.mxu0 %v3742_v6 }
 0xba7   :  { %3405 = vmatprep.subr.mxu0 %v3673_v3 }
 0xba8   :  { %3406 = vmatpush3.msra.mxu0 %v3752_v7 }
 0xba9   :  { %3421 = vmatprep.subr.mxu0 %v3673_v3 }
 0xc15   :  { %v1393_v31 = vpop.permute.xlu1 %1392 }
 0xc16   :  { %1395 = vst.msk [vmem:[%s4412_s5 + $0x6] sm:$0x3] %vm342_vm4, %v1393_v31 }
 0xc61   :  { %v1465_v33 = vpop.f32.mrf.mxu0 }
 0xc62   :  { %v1470_v34 = vrot.slane %v1465_v33, 4 }
 0xc63   :  { %v3387_v35 = vpop.f32.mrf.mxu0 }
 0xc64   :  { %v1472_v36 = vadd.f32 %v1470_v34, %v4050_v19 }
 0xc66   :  { %3610 = vtanh.f32 %v1472_v36 }
 0xc73   :  { %v3611_v37 = vpop.eup %3610 }
 0xc74   :  { %v1487_v44 = vrot.slane %v3611_v37, 4  ;;  %v1475_v45 = vcombine.high %v3611_v37, %v3611_v37 }
 0xc76   :  { %3397 = vmatmul.mubr.msk.f32.vlgmr.msra.gmra.mxu1 %vm174_vm2, %v1487_v44  ;;  %v1482_v46 = vrot.slane %v1475_v45, %v3833_v32 }
 0xc77   :  { %3411 = vmatpush3.msra.mxu1 %v3724_v2  ;;  %3418 = vmatprep.mubr.msk.f32.mxu1 %vm3674_vm1, %v3673_v3 }
 0xc78   :  { %1483 = vrot.lane.b32.xlu1 %v1482_v46, %s3677_s1  ;;  %3412 = vmatprep.subr.mxu1 %v3673_v3  ;;  %v4239_v46 = vld [vmem:[%s4409_s2 + $0x8] sm:$0xff] }
 0xc79   :  { %3413 = vmatpush3.msra.mxu1 %v3734_v5 }
 0xc7a   :  { %3414 = vmatprep.subr.mxu1 %v3673_v3 }
 0xc7b   :  { %3415 = vmatpush3.msra.mxu1 %v3742_v6 }
 0xc7c   :  { %3416 = vmatprep.subr.mxu1 %v3673_v3 }
 0xc7d   :  { %3417 = vmatpush3.msra.mxu1 %v3752_v7 }
 0xc7e   :  { %3432 = vmatprep.subr.mxu1 %v3673_v3 }
 0xcea   :  { %v1484_v47 = vpop.permute.xlu1 %1483 }
 0xceb   :  { %1486 = vst.msk [vmem:[%s4412_s5 + $0x6] sm:$0x3] %vm434_vm5, %v1484_v47  ;;  %v4246_v47 = vld [vmem:[%s4409_s2] sm:$0xff] }
 0xd36   :  { %v1556_v48 = vpop.f32.mrf.mxu1 }
 0xd37   :  { %v1561_v49 = vrot.slane %v1556_v48, 2 }
 0xd38   :  { %v3398_v39 = vpop.f32.mrf.mxu1 }
 0xd39   :  { %v1563_v50 = vadd.f32 %v1561_v49, %v4050_v19 }
 0xd3b   :  { %3612 = vtanh.f32 %v1563_v50 }
 0xd48   :  { %v3613_v51 = vpop.eup %3612 }
 0xd49   :  { %v1579_v52 = vrot.slane %v3613_v51, 6  ;;  %v1566_v53 = vcombine.high %v3613_v51, %v3613_v51 }
 0xd4b   :  { %3408 = vmatmul.mubr.msk.f32.vlgmr.msra.gmra.mxu0 %vm174_vm2, %v1579_v52  ;;  %v1573_v54 = vrot.slane %v1566_v53, %v3833_v32 }
 0xd4c   :  { %3422 = vmatpush3.msra.mxu0 %v3724_v2  ;;  %3429 = vmatprep.mubr.msk.f32.mxu0 %vm3674_vm1, %v3673_v3 }
 0xd4d   :  { %v1574_v55 = vcombine.high %v1573_v54, %v1573_v54  ;;  %3423 = vmatprep.subr.mxu0 %v3673_v3 }
 0xd4e   :  { %3424 = vmatpush3.msra.mxu0 %v3734_v5 }
 0xd4f   :  { %1575 = vrot.lane.b32.xlu1 %v1574_v55, %s3678_s7  ;;  %3425 = vmatprep.subr.mxu0 %v3673_v3 }
 0xd50   :  { %3426 = vmatpush3.msra.mxu0 %v3742_v6 }
 0xd51   :  { %3427 = vmatprep.subr.mxu0 %v3673_v3 }
 0xd52   :  { %3428 = vmatpush3.msra.mxu0 %v3752_v7 }
 0xd53   :  { %3443 = vmatprep.subr.mxu0 %v3673_v3 }
 0xdc1   :  { %v1576_v56 = vpop.permute.xlu1 %1575 }
 0xdc2   :  { %1578 = vst.msk [vmem:[%s4412_s5 + $0x6] sm:$0x3] %vm527_vm6, %v1576_v56 }
 0xe0b   :  { %v1648_v58 = vpop.f32.mrf.mxu0 }
 0xe0c   :  { %v1652_v59 = vadd.f32 %v1648_v58, %v4124_v57 }
 0xe0d   :  { %v3409_v60 = vpop.f32.mrf.mxu0 }
 0xe0e   :  { %3614 = vtanh.f32 %v1652_v59 }
 0xe1b   :  { %v3615_v61 = vpop.eup %3614 }
 0xe1c   :  { %1654 = vst.msk [vmem:[%s4412_s5 + $0x8] sm:$0x3] %vm250_vm3, %v3615_v61  ;;  %3419 = vmatmul.mubr.msk.f32.vlgmr.msra.gmra.mxu1 %vm174_vm2, %v3615_v61 }
 0xe1d   :  { %3433 = vmatpush3.msra.mxu1 %v3724_v2  ;;  %3440 = vmatprep.mubr.msk.f32.mxu1 %vm3674_vm1, %v3673_v3 }
 0xe1e   :  { %3434 = vmatprep.subr.mxu1 %v3673_v3 }
 0xe1f   :  { %3435 = vmatpush3.msra.mxu1 %v3734_v5 }
 0xe20   :  { %3436 = vmatprep.subr.mxu1 %v3673_v3 }
 0xe21   :  { %3437 = vmatpush3.msra.mxu1 %v3742_v6 }
 0xe22   :  { %3438 = vmatprep.subr.mxu1 %v3673_v3 }
 0xe23   :  { %3439 = vmatpush3.msra.mxu1 %v3752_v7 }
 0xe24   :  { %3454 = vmatprep.subr.mxu1 %v3673_v3 }
 0xedc   :  { %v1724_v41 = vpop.f32.mrf.mxu1 }
 0xedd   :  { %v1729_v62 = vrot.slane %v1724_v41, 6 }
 0xede   :  { %v3420_v63 = vpop.f32.mrf.mxu1 }
 0xedf   :  { %v1731_v0 = vadd.f32 %v1729_v62, %v4124_v57 }
 0xee1   :  { %3616 = vtanh.f32 %v1731_v0 }
 0xeee   :  { %v3617_v1 = vpop.eup %3616 }
 0xeef   :  { %v1746_v4 = vrot.slane %v3617_v1, 2  ;;  %v1740_v8 = vrot.slane %v3617_v1, %v3833_v32 }
 0xef1   :  { %3430 = vmatmul.mubr.msk.f32.vlgmr.msra.gmra.mxu0 %vm174_vm2, %v1746_v4  ;;  %v1741_v9 = vcombine.high %v1740_v8, %v1740_v8  ;;  %v4293_v4 = vld [vmem:[%s4410_s3] ss:$0 sm:$0xff] }
 0xef2   :  { %3444 = vmatpush3.msra.mxu0 %v3724_v2  ;;  %3451 = vmatprep.mubr.msk.f32.mxu0 %vm3674_vm1, %v3673_v3  ;;  %v4297_v8 = vadd.f32 %v4293_v4, %v3862_v43 }
 0xef3   :  { %1742 = vrot.lane.b32.xlu0 %v1741_v9, %s3676_s0  ;;  %3445 = vmatprep.subr.mxu0 %v3673_v3 }
 0xef4   :  { %3446 = vmatpush3.msra.mxu0 %v3734_v5 }
 0xef5   :  { %3447 = vmatprep.subr.mxu0 %v3673_v3 }
 0xef6   :  { %3448 = vmatpush3.msra.mxu0 %v3742_v6 }
 0xef7   :  { %3449 = vmatprep.subr.mxu0 %v3673_v3 }
 0xef8   :  { %3450 = vmatpush3.msra.mxu0 %v3752_v7 }
 0xef9   :  { %3465 = vmatprep.subr.mxu0 %v3673_v3 }
 0xf65   :  { %v1743_v11 = vpop.permute.xlu0 %1742 }
 0xf66   :  { %1745 = vst.msk [vmem:[%s4412_s5 + $0x8] sm:$0x3] %vm342_vm4, %v1743_v11 }
 0xfb1   :  { %v1815_v12 = vpop.f32.mrf.mxu0 }
 0xfb2   :  { %v1820_v13 = vrot.slane %v1815_v12, 4 }
 0xfb3   :  { %v3431_v14 = vpop.f32.mrf.mxu0 }
 0xfb4   :  { %v1822_v15 = vadd.f32 %v1820_v13, %v4124_v57 }
 0xfb6   :  { %3618 = vtanh.f32 %v1822_v15 }
 0xfc3   :  { %v3619_v16 = vpop.eup %3618 }
 0xfc4   :  { %v1837_v17 = vrot.slane %v3619_v16, 4  ;;  %v1825_v18 = vcombine.high %v3619_v16, %v3619_v16 }
 0xfc6   :  { %3441 = vmatmul.mubr.msk.f32.vlgmr.msra.gmra.mxu1 %vm174_vm2, %v1837_v17  ;;  %v1832_v19 = vrot.slane %v1825_v18, %v3833_v32 }
 0xfc7   :  { %3455 = vmatpush3.msra.mxu1 %v3724_v2  ;;  %3462 = vmatprep.mubr.msk.f32.mxu1 %vm3674_vm1, %v3673_v3 }
 0xfc8   :  { %1833 = vrot.lane.b32.xlu0 %v1832_v19, %s3677_s1  ;;  %3456 = vmatprep.subr.mxu1 %v3673_v3 }
 0xfc9   :  { %3457 = vmatpush3.msra.mxu1 %v3734_v5 }
 0xfca   :  { %3458 = vmatprep.subr.mxu1 %v3673_v3 }
 0xfcb   :  { %3459 = vmatpush3.msra.mxu1 %v3742_v6 }
 0xfcc   :  { %3460 = vmatprep.subr.mxu1 %v3673_v3 }
 0xfcd   :  { %3461 = vmatpush3.msra.mxu1 %v3752_v7 }
 0xfce   :  { %3476 = vmatprep.subr.mxu1 %v3673_v3 }
0x103a   :  { %v1834_v20 = vpop.permute.xlu0 %1833 }
0x103b   :  { %1836 = vst.msk [vmem:[%s4412_s5 + $0x8] sm:$0x3] %vm434_vm5, %v1834_v20 }
0x1086   :  { %v1906_v21 = vpop.f32.mrf.mxu1 }
0x1087   :  { %v1911_v22 = vrot.slane %v1906_v21, 2 }
0x1088   :  { %v3442_v23 = vpop.f32.mrf.mxu1 }
0x1089   :  { %v1913_v38 = vadd.f32 %v1911_v22, %v4124_v57 }
0x108b   :  { %3620 = vtanh.f32 %v1913_v38 }
0x1098   :  { %v3621_v24 = vpop.eup %3620 }
0x1099   :  { %v1929_v25 = vrot.slane %v3621_v24, 6  ;;  %v1916_v26 = vcombine.high %v3621_v24, %v3621_v24 }
0x109b   :  { %3452 = vmatmul.mubr.msk.f32.vlgmr.msra.gmra.mxu0 %vm174_vm2, %v1929_v25  ;;  %v1923_v27 = vrot.slane %v1916_v26, %v3833_v32 }
0x109c   :  { %3466 = vmatpush3.msra.mxu0 %v3724_v2  ;;  %3473 = vmatprep.mubr.msk.f32.mxu0 %vm3674_vm1, %v3673_v3 }
0x109d   :  { %v1924_v28 = vcombine.high %v1923_v27, %v1923_v27  ;;  %3467 = vmatprep.subr.mxu0 %v3673_v3 }
0x109e   :  { %3468 = vmatpush3.msra.mxu0 %v3734_v5 }
0x109f   :  { %1925 = vrot.lane.b32.xlu0 %v1924_v28, %s3678_s7  ;;  %3469 = vmatprep.subr.mxu0 %v3673_v3 }
0x10a0   :  { %3470 = vmatpush3.msra.mxu0 %v3742_v6 }
0x10a1   :  { %3471 = vmatprep.subr.mxu0 %v3673_v3 }
0x10a2   :  { %3472 = vmatpush3.msra.mxu0 %v3752_v7 }
0x10a3   :  { %3487 = vmatprep.subr.mxu0 %v3673_v3 }
0x1111   :  { %v1926_v29 = vpop.permute.xlu0 %1925 }
0x1112   :  { %1928 = vst.msk [vmem:[%s4412_s5 + $0x8] sm:$0x3] %vm527_vm6, %v1926_v29 }
0x115b   :  { %v1998_v31 = vpop.f32.mrf.mxu0 }
0x115c   :  { %v2002_v33 = vadd.f32 %v1998_v31, %v4198_v30 }
0x115d   :  { %v3453_v34 = vpop.f32.mrf.mxu0 }
0x115e   :  { %3622 = vtanh.f32 %v2002_v33 }
0x116b   :  { %v3623_v35 = vpop.eup %3622 }
0x116c   :  { %2004 = vst.msk [vmem:[%s4412_s5 + $0xa] sm:$0x3] %vm250_vm3, %v3623_v35  ;;  %3463 = vmatmul.mubr.msk.f32.vlgmr.msra.gmra.mxu1 %vm174_vm2, %v3623_v35 }
0x116d   :  { %3477 = vmatpush3.msra.mxu1 %v3724_v2  ;;  %3484 = vmatprep.mubr.msk.f32.mxu1 %vm3674_vm1, %v3673_v3 }
0x116e   :  { %3478 = vmatprep.subr.mxu1 %v3673_v3 }
0x116f   :  { %3479 = vmatpush3.msra.mxu1 %v3734_v5 }
0x1170   :  { %3480 = vmatprep.subr.mxu1 %v3673_v3 }
0x1171   :  { %3481 = vmatpush3.msra.mxu1 %v3742_v6  ;;  %v4222_v6 = vld [vmem:[%s4409_s2 + $0x18] sm:$0xff] }
0x1172   :  { %3482 = vmatprep.subr.mxu1 %v3673_v3 }
0x1173   :  { %3483 = vmatpush3.msra.mxu1 %v3752_v7  ;;  %v4232_v7 = vld [vmem:[%s4409_s2 + $0x10] sm:$0xff] }
0x1174   :  { %3498 = vmatprep.subr.mxu1 %v3673_v3 }
0x122c   :  { %v2074_v10 = vpop.f32.mrf.mxu1 }
0x122d   :  { %v2079_v40 = vrot.slane %v2074_v10, 6 }
0x122e   :  { %v3464_v2 = vpop.f32.mrf.mxu1 }
0x122f   :  { %v2081_v36 = vadd.f32 %v2079_v40, %v4198_v30 }
0x1231   :  { %3624 = vtanh.f32 %v2081_v36 }
0x123e   :  { %v3625_v37 = vpop.eup %3624 }
0x123f   :  { %v2096_v44 = vrot.slane %v3625_v37, 2  ;;  %v2090_v5 = vrot.slane %v3625_v37, %v3833_v32 }
0x1241   :  { %3474 = vmatmul.mubr.msk.f32.vlgmr.msra.gmra.mxu0 %vm174_vm2, %v2096_v44  ;;  %v2091_v45 = vcombine.high %v2090_v5, %v2090_v5  ;;  %v166_v44 = vadd.f32 %v4293_v4, %v3860_v42 }
0x1242   :  { %3488 = vmatpush3.msra.mxu0 %v4222_v6  ;;  %3495 = vmatprep.mubr.msk.f32.mxu0 %vm3674_vm1, %v3673_v3 }
0x1243   :  { %2092 = vrot.lane.b32.xlu1 %v2091_v45, %s3676_s0  ;;  %3489 = vmatprep.subr.mxu0 %v3673_v3 }
0x1244   :  { %3490 = vmatpush3.msra.mxu0 %v4232_v7 }
0x1245   :  { %3491 = vmatprep.subr.mxu0 %v3673_v3 }
0x1246   :  { %3492 = vmatpush3.msra.mxu0 %v4239_v46 }
0x1247   :  { %3493 = vmatprep.subr.mxu0 %v3673_v3 }
0x1248   :  { %3494 = vmatpush3.msra.mxu0 %v4246_v47 }
0x1249   :  { %3509 = vmatprep.subr.mxu0 %v3673_v3 }
0x12b5   :  { %v2093_v48 = vpop.permute.xlu1 %2092 }
0x12b6   :  { %2095 = vst.msk [vmem:[%s4412_s5 + $0xa] sm:$0x3] %vm342_vm4, %v2093_v48 }
0x1301   :  { %v2165_v49 = vpop.f32.mrf.mxu0 }
0x1302   :  { %v2170_v39 = vrot.slane %v2165_v49, 4 }
0x1303   :  { %v3475_v50 = vpop.f32.mrf.mxu0 }
0x1304   :  { %v2172_v51 = vadd.f32 %v2170_v39, %v4198_v30 }
0x1306   :  { %3626 = vtanh.f32 %v2172_v51 }
0x1313   :  { %v3627_v52 = vpop.eup %3626 }
0x1314   :  { %v2187_v53 = vrot.slane %v3627_v52, 4  ;;  %v2175_v54 = vcombine.high %v3627_v52, %v3627_v52 }
0x1316   :  { %3485 = vmatmul.mubr.msk.f32.vlgmr.msra.gmra.mxu1 %vm174_vm2, %v2187_v53  ;;  %v2182_v55 = vrot.slane %v2175_v54, %v3833_v32 }
0x1317   :  { %3499 = vmatpush3.msra.mxu1 %v4222_v6  ;;  %3506 = vmatprep.mubr.msk.f32.mxu1 %vm3674_vm1, %v3673_v3 }
0x1318   :  { %2183 = vrot.lane.b32.xlu1 %v2182_v55, %s3677_s1  ;;  %3500 = vmatprep.subr.mxu1 %v3673_v3 }
0x1319   :  { %3501 = vmatpush3.msra.mxu1 %v4232_v7 }
0x131a   :  { %3502 = vmatprep.subr.mxu1 %v3673_v3 }
0x131b   :  { %3503 = vmatpush3.msra.mxu1 %v4239_v46 }
0x131c   :  { %3504 = vmatprep.subr.mxu1 %v3673_v3 }
0x131d   :  { %3505 = vmatpush3.msra.mxu1 %v4246_v47 }
0x131e   :  { %3520 = vmatprep.subr.mxu1 %v3673_v3 }
0x138a   :  { %v2184_v56 = vpop.permute.xlu1 %2183 }
0x138b   :  { %2186 = vst.msk [vmem:[%s4412_s5 + $0xa] sm:$0x3] %vm434_vm5, %v2184_v56 }
0x13d6   :  { %v2256_v57 = vpop.f32.mrf.mxu1 }
0x13d7   :  { %v2261_v58 = vrot.slane %v2256_v57, 2 }
0x13d8   :  { %v3486_v59 = vpop.f32.mrf.mxu1 }
0x13d9   :  { %v2263_v60 = vadd.f32 %v2261_v58, %v4198_v30 }
0x13db   :  { %3628 = vtanh.f32 %v2263_v60 }
0x13e8   :  { %v3629_v61 = vpop.eup %3628 }
0x13e9   :  { %v2279_v41 = vrot.slane %v3629_v61, 6  ;;  %v2266_v62 = vcombine.high %v3629_v61, %v3629_v61 }
0x13eb   :  { %3496 = vmatmul.mubr.msk.f32.vlgmr.msra.gmra.mxu0 %vm174_vm2, %v2279_v41  ;;  %v2273_v63 = vrot.slane %v2266_v62, %v3833_v32 }
0x13ec   :  { %3510 = vmatpush3.msra.mxu0 %v4222_v6  ;;  %3517 = vmatprep.mubr.msk.f32.mxu0 %vm3674_vm1, %v3673_v3 }
0x13ed   :  { %v2274_v0 = vcombine.high %v2273_v63, %v2273_v63  ;;  %3511 = vmatprep.subr.mxu0 %v3673_v3 }
0x13ee   :  { %3512 = vmatpush3.msra.mxu0 %v4232_v7 }
0x13ef   :  { %2275 = vrot.lane.b32.xlu1 %v2274_v0, %s3678_s7  ;;  %3513 = vmatprep.subr.mxu0 %v3673_v3 }
0x13f0   :  { %3514 = vmatpush3.msra.mxu0 %v4239_v46 }
0x13f1   :  { %3515 = vmatprep.subr.mxu0 %v3673_v3 }
0x13f2   :  { %3516 = vmatpush3.msra.mxu0 %v4246_v47 }
0x13f3   :  { %3531 = vmatprep.subr.mxu0 %v3673_v3 }
0x1461   :  { %v2276_v1 = vpop.permute.xlu1 %2275 }
0x1462   :  { %2278 = vst.msk [vmem:[%s4412_s5 + $0xa] sm:$0x3] %vm527_vm6, %v2276_v1 }
0x14ab   :  { %v2348_v9 = vpop.f32.mrf.mxu0 }
0x14ac   :  { %v2352_v11 = vadd.f32 %v2348_v9, %v4297_v8 }
0x14ad   :  { %v3497_v12 = vpop.f32.mrf.mxu0 }
0x14ae   :  { %3630 = vtanh.f32 %v2352_v11 }
0x14bb   :  { %v3631_v13 = vpop.eup %3630 }
0x14bc   :  { %2354 = vst.msk [vmem:[%s4412_s5 + $0xc] sm:$0x3] %vm250_vm3, %v3631_v13  ;;  %3507 = vmatmul.mubr.msk.f32.vlgmr.msra.gmra.mxu1 %vm174_vm2, %v3631_v13 }
0x14bd   :  { %3521 = vmatpush3.msra.mxu1 %v4222_v6  ;;  %3528 = vmatprep.mubr.msk.f32.mxu1 %vm3674_vm1, %v3673_v3 }
0x14be   :  { %3522 = vmatprep.subr.mxu1 %v3673_v3 }
0x14bf   :  { %3523 = vmatpush3.msra.mxu1 %v4232_v7 }
0x14c0   :  { %3524 = vmatprep.subr.mxu1 %v3673_v3 }
0x14c1   :  { %3525 = vmatpush3.msra.mxu1 %v4239_v46 }
0x14c2   :  { %3526 = vmatprep.subr.mxu1 %v3673_v3 }
0x14c3   :  { %3527 = vmatpush3.msra.mxu1 %v4246_v47 }
0x14c4   :  { %3542 = vmatprep.subr.mxu1 %v3673_v3 }
0x157c   :  { %v2424_v43 = vpop.f32.mrf.mxu1 }
0x157d   :  { %v2429_v14 = vrot.slane %v2424_v43, 6 }
0x157e   :  { %v3508_v15 = vpop.f32.mrf.mxu1 }
0x157f   :  { %v2431_v16 = vadd.f32 %v2429_v14, %v4297_v8 }
0x1581   :  { %3632 = vtanh.f32 %v2431_v16 }
0x158e   :  { %v3633_v17 = vpop.eup %3632 }
0x158f   :  { %v2446_v18 = vrot.slane %v3633_v17, 2  ;;  %v2440_v19 = vrot.slane %v3633_v17, %v3833_v32 }
0x1591   :  { %3518 = vmatmul.mubr.msk.f32.vlgmr.msra.gmra.mxu0 %vm174_vm2, %v2446_v18  ;;  %v2441_v20 = vcombine.high %v2440_v19, %v2440_v19 }
0x1592   :  { %3532 = vmatpush3.msra.mxu0 %v4222_v6  ;;  %3539 = vmatprep.mubr.msk.f32.mxu0 %vm3674_vm1, %v3673_v3 }
0x1593   :  { %2442 = vrot.lane.b32.xlu0 %v2441_v20, %s3676_s0  ;;  %3533 = vmatprep.subr.mxu0 %v3673_v3 }
0x1594   :  { %3534 = vmatpush3.msra.mxu0 %v4232_v7 }
0x1595   :  { %3535 = vmatprep.subr.mxu0 %v3673_v3 }
0x1596   :  { %3536 = vmatpush3.msra.mxu0 %v4239_v46 }
0x1597   :  { %3537 = vmatprep.subr.mxu0 %v3673_v3 }
0x1598   :  { %3538 = vmatpush3.msra.mxu0 %v4246_v47 }
0x1599   :  { %3553 = vmatprep.subr.mxu0 %v3673_v3 }
0x1605   :  { %v2443_v21 = vpop.permute.xlu0 %2442 }
0x1606   :  { %2445 = vst.msk [vmem:[%s4412_s5 + $0xc] sm:$0x3] %vm342_vm4, %v2443_v21 }
0x1651   :  { %v2515_v22 = vpop.f32.mrf.mxu0 }
0x1652   :  { %v2520_v23 = vrot.slane %v2515_v22, 4 }
0x1653   :  { %v3519_v38 = vpop.f32.mrf.mxu0 }
0x1654   :  { %v2522_v24 = vadd.f32 %v2520_v23, %v4297_v8 }
0x1656   :  { %3634 = vtanh.f32 %v2522_v24 }
0x1663   :  { %v3635_v25 = vpop.eup %3634 }
0x1664   :  { %v2537_v26 = vrot.slane %v3635_v25, 4  ;;  %v2525_v27 = vcombine.high %v3635_v25, %v3635_v25 }
0x1666   :  { %3529 = vmatmul.mubr.msk.f32.vlgmr.msra.gmra.mxu1 %vm174_vm2, %v2537_v26  ;;  %v2532_v28 = vrot.slane %v2525_v27, %v3833_v32 }
0x1667   :  { %3543 = vmatpush3.msra.mxu1 %v4222_v6  ;;  %3550 = vmatprep.mubr.msk.f32.mxu1 %vm3674_vm1, %v3673_v3 }
0x1668   :  { %2533 = vrot.lane.b32.xlu0 %v2532_v28, %s3677_s1  ;;  %3544 = vmatprep.subr.mxu1 %v3673_v3 }
0x1669   :  { %3545 = vmatpush3.msra.mxu1 %v4232_v7 }
0x166a   :  { %3546 = vmatprep.subr.mxu1 %v3673_v3 }
0x166b   :  { %3547 = vmatpush3.msra.mxu1 %v4239_v46 }
0x166c   :  { %3548 = vmatprep.subr.mxu1 %v3673_v3 }
0x166d   :  { %3549 = vmatpush3.msra.mxu1 %v4246_v47 }
0x166e   :  { %3564 = vmatprep.subr.mxu1 %v3673_v3 }
0x16da   :  { %v2534_v29 = vpop.permute.xlu0 %2533 }
0x16db   :  { %2536 = vst.msk [vmem:[%s4412_s5 + $0xc] sm:$0x3] %vm434_vm5, %v2534_v29 }
0x1726   :  { %v2606_v30 = vpop.f32.mrf.mxu1 }
0x1727   :  { %v2611_v31 = vrot.slane %v2606_v30, 2 }
0x1728   :  { %v3530_v33 = vpop.f32.mrf.mxu1 }
0x1729   :  { %v2613_v34 = vadd.f32 %v2611_v31, %v4297_v8 }
0x172b   :  { %3636 = vtanh.f32 %v2613_v34 }
0x1738   :  { %v3637_v35 = vpop.eup %3636 }
0x1739   :  { %v2629_v10 = vrot.slane %v3637_v35, 6  ;;  %v2616_v40 = vcombine.high %v3637_v35, %v3637_v35 }
0x173b   :  { %3540 = vmatmul.mubr.msk.f32.vlgmr.msra.gmra.mxu0 %vm174_vm2, %v2629_v10  ;;  %v2623_v2 = vrot.slane %v2616_v40, %v3833_v32 }
0x173c   :  { %3554 = vmatpush3.msra.mxu0 %v4222_v6  ;;  %3561 = vmatprep.mubr.msk.f32.mxu0 %vm3674_vm1, %v3673_v3 }
0x173d   :  { %v2624_v36 = vcombine.high %v2623_v2, %v2623_v2  ;;  %3555 = vmatprep.subr.mxu0 %v3673_v3 }
0x173e   :  { %3556 = vmatpush3.msra.mxu0 %v4232_v7 }
0x173f   :  { %2625 = vrot.lane.b32.xlu0 %v2624_v36, %s3678_s7  ;;  %3557 = vmatprep.subr.mxu0 %v3673_v3 }
0x1740   :  { %3558 = vmatpush3.msra.mxu0 %v4239_v46 }
0x1741   :  { %3559 = vmatprep.subr.mxu0 %v3673_v3 }
0x1742   :  { %3560 = vmatpush3.msra.mxu0 %v4246_v47 }
0x17b1   :  { %v2626_v37 = vpop.permute.xlu0 %2625 }
0x17b2   :  { %2628 = vst.msk [vmem:[%s4412_s5 + $0xc] sm:$0x3] %vm527_vm6, %v2626_v37 }
0x17fb   :  { %v2698_v5 = vpop.f32.mrf.mxu0 }
0x17fc   :  { %v2702_v45 = vadd.f32 %v2698_v5, %v166_v44 }
0x17fd   :  { %v3541_v48 = vpop.f32.mrf.mxu0 }
0x17fe   :  { %3638 = vtanh.f32 %v2702_v45 }
0x180b   :  { %v3639_v49 = vpop.eup %3638 }
0x180c   :  { %2704 = vst.msk [vmem:[%s4412_s5 + $0xe] sm:$0x3] %vm250_vm3, %v3639_v49  ;;  %3551 = vmatmul.mubr.msk.f32.vlgmr.msra.gmra.mxu1 %vm174_vm2, %v3639_v49 }
0x180d   :  { %3565 = vmatpush3.msra.mxu1 %v4222_v6  ;;  %3572 = vmatprep.mubr.msk.f32.mxu1 %vm3674_vm1, %v3673_v3 }
0x180e   :  { %3566 = vmatprep.subr.mxu1 %v3673_v3 }
0x180f   :  { %3567 = vmatpush3.msra.mxu1 %v4232_v7 }
0x1810   :  { %3568 = vmatprep.subr.mxu1 %v3673_v3 }
0x1811   :  { %3569 = vmatpush3.msra.mxu1 %v4239_v46 }
0x1812   :  { %3570 = vmatprep.subr.mxu1 %v3673_v3 }
0x1813   :  { %3571 = vmatpush3.msra.mxu1 %v4246_v47 }
0x18cc   :  { %v2774_v42 = vpop.f32.mrf.mxu1 }
0x18cd   :  { %v2779_v39 = vrot.slane %v2774_v42, 6 }
0x18ce   :  { %v3552_v50 = vpop.f32.mrf.mxu1 }
0x18cf   :  { %v2781_v51 = vadd.f32 %v2779_v39, %v166_v44 }
0x18d1   :  { %3640 = vtanh.f32 %v2781_v51 }
0x18de   :  { %v3641_v6 = vpop.eup %3640 }
0x18df   :  { %v2796_v52 = vrot.slane %v3641_v6, 2  ;;  %v2790_v53 = vrot.slane %v3641_v6, %v3833_v32 }
0x18e1   :  { %3562 = vmatmul.mubr.msk.f32.vlgmr.msra.gmra.mxu0 %vm174_vm2, %v2796_v52  ;;  %v2791_v7 = vcombine.high %v2790_v53, %v2790_v53 }
0x18e3   :  { %2792 = vrot.lane.b32.xlu1 %v2791_v7, %s3676_s0 }
0x1955   :  { %v2793_v54 = vpop.permute.xlu1 %2792 }
0x1956   :  { %2795 = vst.msk [vmem:[%s4412_s5 + $0xe] sm:$0x3] %vm342_vm4, %v2793_v54 }
0x19a1   :  { %v2865_v3 = vpop.f32.mrf.mxu0 }
0x19a2   :  { %v2870_v46 = vrot.slane %v2865_v3, 4 }
0x19a3   :  { %v3563_v47 = vpop.f32.mrf.mxu0 }
0x19a4   :  { %v2872_v55 = vadd.f32 %v2870_v46, %v166_v44 }
0x19a6   :  { %3642 = vtanh.f32 %v2872_v55 }
0x19b3   :  { %v3643_v56 = vpop.eup %3642 }
0x19b4   :  { %v2887_v57 = vrot.slane %v3643_v56, 4  ;;  %v2875_v58 = vcombine.high %v3643_v56, %v3643_v56 }
0x19b6   :  { %3573 = vmatmul.mubr.msk.f32.vlgmr.msra.gmra.mxu1 %vm174_vm2, %v2887_v57  ;;  %v2882_v59 = vrot.slane %v2875_v58, %v3833_v32 }
0x19b8   :  { %2883 = vrot.lane.b32.xlu1 %v2882_v59, %s3677_s1 }
0x1a2a   :  { %v2884_v60 = vpop.permute.xlu1 %2883 }
0x1a2b   :  { %2886 = vst.msk [vmem:[%s4412_s5 + $0xe] sm:$0x3] %vm434_vm5, %v2884_v60 }
0x1a76   :  { %v2956_v61 = vpop.f32.mrf.mxu1 }
0x1a77   :  { %v2961_v41 = vrot.slane %v2956_v61, 2 }
0x1a78   :  { %v3574_v62 = vpop.f32.mrf.mxu1 }
0x1a79   :  { %v2963_v63 = vadd.f32 %v2961_v41, %v166_v44 }
0x1a7b   :  { %3644 = vtanh.f32 %v2963_v63 }
0x1a88   :  { %v3645_v0 = vpop.eup %3644 }
0x1a89   :  { %v2966_v1 = vcombine.high %v3645_v0, %v3645_v0  ;;  %2980 = vst.msk [vmem:[#allocation2 - $0x6] sm:$0xc0] %vm2979_vm7, %v3645_v0 }
0x1a8a   :  { %3662 = shalt.err (!%p3659_p4)
}
0x1a8b   :  { %2992 = dma.vmem_to_hbm [thread:$0]  %s2990_s23, 32, %s4413_s6, [#allocation3]   ;;  %v2973_v4 = vrot.slane %v2966_v1, %v3833_v32 }
0x1a8d   :  { %v2974_v8 = vcombine.high %v2973_v4, %v2973_v4 }
0x1a8f   :  { %2975 = vrot.lane.b32.xlu1 %v2974_v8, %s3678_s7 }
0x1b01   :  { %v2976_v9 = vpop.permute.xlu1 %2975 }
0x1b02   :  { %2978 = vst.msk [vmem:[%s4412_s5 + $0xe] sm:$0x3] %vm527_vm6, %v2976_v9 }
0x1b03   :  { %3671 = dma.done.wait [#allocation3], 32  }
0x1b04   :  { %3672 = vsyncadd [#allocation3], 4294967264 }
0x1b05   :  { %2998 = vsyncpa [#allocation3], 1 }

</bundles_post_ra>
